<compile_context>
chip_gen: v6e
topology: v6e:2x2x1
jax: 0.10.0
libtpu: 0.0.40
codegen_flags: <defaults>
</compile_context>

<pallas_src>
import math
import numpy as np
import jax
import jax.numpy as jnp
from jax.experimental import pallas as pl
from jax.experimental.pallas import tpu as pltpu

# ---------------- model config (small, synthetic) ----------------
B = 2                  # batch
PREFIX_LENGTH = 4      # soft-prefix length
T_LEN = 8              # target caption length
S_REAL = PREFIX_LENGTH + T_LEN   # 12 real positions per sequence
S_PAD = 16             # padded rows per sequence (full bf16 sublane pack)
HIDDEN = 64
N_HEADS = 2
HEAD_DIM = HIDDEN // N_HEADS     # 32
INTER = 128
VOCAB = 256
N_LAYERS = 2
EPS = 1e-6
ROPE_THETA = 10000.0


# ---------------- fused kernel: full forward for ONE sequence ----------------
def fused_forward_kernel(*refs):
    x_ref = refs[0]
    layer_refs = refs[1:1 + 6 * N_LAYERS]
    cos_ref, sin_ref, mask_ref, fn_ref, lm_ref, lab_ref, o_ref = refs[1 + 6 * N_LAYERS:]

    D = HIDDEN
    x = x_ref[...]                       # (S_PAD, D) f32
    cos2 = cos_ref[...]                  # (S_PAD, 2D) = (16, 128), tiled for [q|k]
    sin2 = sin_ref[...]
    mask = mask_ref[...]                 # (S_PAD, S_PAD) additive causal mask
    scale = jnp.float32(1.0 / math.sqrt(HEAD_DIM))

    for l in range(N_LAYERS):
        ln1, wqkvr, wo, ln2, wgu, wd = layer_refs[6 * l:6 * l + 6]

        # --- self-attention block ---
        var = jnp.mean(x * x, axis=-1, keepdims=True)
        h = (x * jax.lax.rsqrt(var + EPS) * ln1[...]).astype(jnp.bfloat16)
        # fused projection (S_PAD, 384): cols [q|k | rot(q)|rot(k) | v | 0-pad]
        proj = jnp.dot(h, wqkvr[...], preferred_element_type=jnp.float32)
        # RoPE as one 128-lane-wide FMA (128-aligned free-view slices)
        qk = proj[:, 0:2 * D] * cos2 + proj[:, 2 * D:4 * D] * sin2   # (S_PAD, 128)
        v = proj[:, 4 * D:6 * D]                                     # (S_PAD, 128), last 64 cols zero
        qkb = qk.astype(jnp.bfloat16)
        vb = v.astype(jnp.bfloat16)

        attn = jnp.zeros((S_PAD, D), jnp.float32)
        for hh in range(N_HEADS):
            s0 = hh * HEAD_DIM
            qh = qkb[:, s0:s0 + HEAD_DIM]
            kh = qkb[:, D + s0:D + s0 + HEAD_DIM]
            vh = vb[:, s0:s0 + HEAD_DIM]
            sc = jax.lax.dot_general(qh, kh, (((1,), (1,)), ((), ())),
                                     preferred_element_type=jnp.float32)
            sc = sc * scale + mask
            m = jnp.max(sc, axis=-1, keepdims=True)
            e = jnp.exp(sc - m)
            denom = jnp.sum(e, axis=-1, keepdims=True)
            p = e * pl.reciprocal(denom, approx=True)
            ho = jnp.dot(p.astype(jnp.bfloat16), vh,
                         preferred_element_type=jnp.float32)          # (S_PAD, 32)
            # per-head output projection (sublane slice of wo) — no lane concat
            wo_h = wo[s0:s0 + HEAD_DIM, :]
            attn = attn + jnp.dot(ho.astype(jnp.bfloat16), wo_h,
                                  preferred_element_type=jnp.float32)
        x = x + attn

        # --- SwiGLU MLP block ---
        var2 = jnp.mean(x * x, axis=-1, keepdims=True)
        h2 = (x * jax.lax.rsqrt(var2 + EPS) * ln2[...]).astype(jnp.bfloat16)
        gu = jnp.dot(h2, wgu[...], preferred_element_type=jnp.float32)   # (S_PAD, 2*INTER)
        g = gu[:, :INTER]
        u = gu[:, INTER:]
        act = g * jax.nn.sigmoid(g)                                      # SiLU in f32
        x = x + jnp.dot((act * u).astype(jnp.bfloat16), wd[...],
                        preferred_element_type=jnp.float32)

    # --- final RMSNorm + LM head + shifted masked cross-entropy (per-row) ---
    var = jnp.mean(x * x, axis=-1, keepdims=True)
    hN = (x * jax.lax.rsqrt(var + EPS) * fn_ref[...]).astype(jnp.bfloat16)
    logits = jnp.dot(hN, lm_ref[...], preferred_element_type=jnp.float32)  # (S_PAD, V)
    nxt = lab_ref[...]                                                     # (S_PAD, 1) int32
    m = jnp.max(logits, axis=-1, keepdims=True)
    z = logits - m
    lse = jnp.log(jnp.sum(jnp.exp(z), axis=-1, keepdims=True))
    ids = jax.lax.broadcasted_iota(jnp.int32, (S_PAD, VOCAB), 1)
    valid = nxt != jnp.int32(-100)
    onehot = jnp.logical_and(ids == nxt, valid)
    target_z = jnp.sum(jnp.where(onehot, z, jnp.float32(0.0)),
                       axis=-1, keepdims=True)
    # never materialize full logp; invalid rows contribute exactly 0
    o_ref[...] = (lse - target_z) * valid.astype(jnp.float32)


def run_fused_forward(x_flat, flat_weights, cos2, sin2, mask,
                      final_norm, lm_head, labels_flat):
    Bb = x_flat.shape[0] // S_PAD
    inputs = [x_flat] + list(flat_weights) + [cos2, sin2, mask,
                                              final_norm, lm_head, labels_flat]
    in_specs = [pl.BlockSpec((S_PAD, HIDDEN), lambda b: (b, 0))]      # per-sequence slab
    for w in flat_weights:
        in_specs.append(pl.BlockSpec(w.shape, lambda b: (0, 0)))      # resident, DMA'd once
    for arr in (cos2, sin2, mask, final_norm, lm_head):
        in_specs.append(pl.BlockSpec(arr.shape, lambda b: (0, 0)))
    in_specs.append(pl.BlockSpec((S_PAD, 1), lambda b: (b, 0)))       # labels

    return pl.pallas_call(
        fused_forward_kernel,
        out_shape=jax.ShapeDtypeStruct((Bb * S_PAD, 1), jnp.float32),
        grid=(Bb,),
        in_specs=in_specs,
        out_specs=pl.BlockSpec((S_PAD, 1), lambda b: (b, 0)),
        compiler_params=pltpu.CompilerParams(
            dimension_semantics=("parallel",)),   # batch-parallel (2 TCs on v7x)
    )(*inputs)


# ---------------- glue: params, RoPE tables, fused-weight prep, forward ----------------
def rope_tables(S, hd, theta=ROPE_THETA):
    inv_freq = 1.0 / (theta ** (jnp.arange(0, hd, 2, dtype=jnp.float32) / hd))
    t = jnp.arange(S, dtype=jnp.float32)
    freqs = jnp.outer(t, inv_freq)                      # (S, hd/2)
    emb = jnp.concatenate([freqs, freqs], axis=-1)      # (S, hd)
    return jnp.cos(emb), jnp.sin(emb)


def build_rope_rotation(D, hd):
    # R such that (q @ R) == rotate_half applied per head: [-q2, q1] per head.
    R = np.zeros((D, D), np.float32)
    n_heads = D // hd
    for h in range(n_heads):
        base = h * hd
        for j in range(hd // 2):
            R[base + hd // 2 + j, base + j] = -1.0
            R[base + j, base + hd // 2 + j] = 1.0
    return jnp.asarray(R)


def init_params(key):
    n_keys = 2 + 7 * N_LAYERS
    keys = list(jax.random.split(key, n_keys))
    nk = iter(keys)

    def norm(shape):
        return (0.02 * jax.random.normal(next(nk), shape)).astype(jnp.float32)

    params = {
        "embed": norm((VOCAB, HIDDEN)),
        "layers": [],
        "final_norm": jnp.ones((1, HIDDEN), jnp.float32),
        "lm_head": None,
    }
    for _ in range(N_LAYERS):
        layer = (
            jnp.ones((1, HIDDEN), jnp.float32),   # ln1 (RMSNorm weight)
            norm((HIDDEN, HIDDEN)),               # wq
            norm((HIDDEN, HIDDEN)),               # wk
            norm((HIDDEN, HIDDEN)),               # wv
            norm((HIDDEN, HIDDEN)),               # wo
            jnp.ones((1, HIDDEN), jnp.float32),   # ln2
            norm((HIDDEN, INTER)),                # w_gate
            norm((HIDDEN, INTER)),                # w_up
            norm((INTER, HIDDEN)),                # w_down
        )
        params["layers"].append(layer)
    params["lm_head"] = norm((HIDDEN, VOCAB))
    return params


def prepare_fused_weights(params):
    """Fold rotate_half into Q/K (W@R), fuse projections with 128-aligned layout,
    zero-pad v's column block to 128, cast MXU operands to bf16."""
    R = build_rope_rotation(HIDDEN, HEAD_DIM)
    zpad = jnp.zeros((HIDDEN, HIDDEN), jnp.float32)
    flat = []
    for (ln1, wq, wk, wv, wo, ln2, wg, wu, wd) in params["layers"]:
        # columns: [q | k | rot(q) | rot(k) | v | zeros]  -> (D, 6D) = (64, 384)
        w_qkvr = jnp.concatenate([wq, wk, wq @ R, wk @ R, wv, zpad],
                                 axis=1).astype(jnp.bfloat16)
        w_gu = jnp.concatenate([wg, wu], axis=1).astype(jnp.bfloat16)   # (D, 2*INTER)
        flat += [ln1, w_qkvr, wo.astype(jnp.bfloat16),
                 ln2, w_gu, wd.astype(jnp.bfloat16)]
    return flat, params["final_norm"], params["lm_head"].astype(jnp.bfloat16)


def llama_decoder_with_prefix_loss(params, prefix_embeds, target_input_ids):
    Bb, T = target_input_ids.shape
    # embed_tokens(target_input_ids) — gather stays in JAX glue
    target_embeds = jnp.take(params["embed"], target_input_ids, axis=0)
    x = jnp.concatenate([prefix_embeds.astype(jnp.float32),
                         target_embeds.astype(jnp.float32)], axis=1)   # (B, S_REAL, D)
    S = x.shape[1]
    # pad each sequence to S_PAD rows (clean bf16 packing); pad rows are inert
    x = jnp.pad(x, ((0, 0), (0, S_PAD - S), (0, 0)))
    x_flat = x.reshape(Bb * S_PAD, HIDDEN)

    # RoPE tables widened to 128 lanes: same per-head cos/sin for the q and k halves
    cos, sin = rope_tables(S_PAD, HEAD_DIM)
    cos2 = jnp.tile(cos, (1, 2 * N_HEADS))     # (S_PAD, 128)
    sin2 = jnp.tile(sin, (1, 2 * N_HEADS))

    # per-sequence additive causal mask; padded rows attend only to themselves,
    # real rows never attend to padded rows (built in numpy -> compile-time const)
    pos = np.arange(S_PAD)
    real = pos < S
    allowed = (pos[None, :] <= pos[:, None]) & real[None, :] & real[:, None]
    allowed |= np.eye(S_PAD, dtype=bool)
    mask = jnp.asarray(np.where(allowed, 0.0, -1e9).astype(np.float32))

    # labels: [-100]*prefix ++ target_ids, HF-style shift folded here; pad rows -100
    prefix_labels = jnp.full((Bb, PREFIX_LENGTH), -100, jnp.int32)
    full_labels = jnp.concatenate([prefix_labels,
                                   target_input_ids.astype(jnp.int32)], axis=1)
    next_labels = jnp.concatenate(
        [full_labels[:, 1:], jnp.full((Bb, 1), -100, jnp.int32)], axis=1)
    next_labels = jnp.pad(next_labels, ((0, 0), (0, S_PAD - S)),
                          constant_values=-100)
    labels_flat = next_labels.reshape(Bb * S_PAD, 1)

    flat_weights, final_norm, lm_head = prepare_fused_weights(params)
    loss_rows = run_fused_forward(x_flat, flat_weights, cos2, sin2, mask,
                                  final_norm, lm_head, labels_flat)     # (B*S_PAD, 1)
    count = jnp.sum((labels_flat != -100).astype(jnp.float32))
    return jnp.sum(loss_rows) / jnp.maximum(count, jnp.float32(1.0))


# TODO(synk): generate_with_prefix (autoregressive sampling / KV cache) is not
# implemented here — only the training forward pass (loss) is kernelized.

if __name__ == "__main__":
    key = jax.random.PRNGKey(0)
    k_params, k_prefix, k_ids = jax.random.split(key, 3)

    params = init_params(k_params)
    prefix_embeds = (0.02 * jax.random.normal(
        k_prefix, (B, PREFIX_LENGTH, HIDDEN))).astype(jnp.float32)
    target_input_ids = jax.random.randint(
        k_ids, (B, T_LEN), 0, VOCAB, dtype=jnp.int32)

    loss_fn = jax.jit(lambda pe, ids: llama_decoder_with_prefix_loss(params, pe, ids))
    loss = loss_fn(prefix_embeds, target_input_ids)
    jax.block_until_ready(loss)
    if not bool(jnp.isfinite(loss)):
        raise RuntimeError("non-finite loss")
    print("KERNEL_OK")
</pallas_src>

<mosaic_0001>
module attributes {stable_mosaic.version = 11 : i64} {
  func.func @fused_forward_kernel(%arg0: i32, %arg1: memref<16x64xf32, #tpu.memory_space<vmem>>, %arg2: memref<1x64xf32, #tpu.memory_space<vmem>>, %arg3: memref<64x384xbf16, #tpu.memory_space<vmem>>, %arg4: memref<64x64xbf16, #tpu.memory_space<vmem>>, %arg5: memref<1x64xf32, #tpu.memory_space<vmem>>, %arg6: memref<64x256xbf16, #tpu.memory_space<vmem>>, %arg7: memref<128x64xbf16, #tpu.memory_space<vmem>>, %arg8: memref<1x64xf32, #tpu.memory_space<vmem>>, %arg9: memref<64x384xbf16, #tpu.memory_space<vmem>>, %arg10: memref<64x64xbf16, #tpu.memory_space<vmem>>, %arg11: memref<1x64xf32, #tpu.memory_space<vmem>>, %arg12: memref<64x256xbf16, #tpu.memory_space<vmem>>, %arg13: memref<128x64xbf16, #tpu.memory_space<vmem>>, %arg14: memref<16x128xf32, #tpu.memory_space<vmem>>, %arg15: memref<16x128xf32, #tpu.memory_space<vmem>>, %arg16: memref<16x16xf32, #tpu.memory_space<vmem>>, %arg17: memref<1x64xf32, #tpu.memory_space<vmem>>, %arg18: memref<64x256xbf16, #tpu.memory_space<vmem>>, %arg19: memref<16x1xi32, #tpu.memory_space<vmem>>, %arg20: memref<16x1xf32, #tpu.memory_space<vmem>>) attributes {dimension_semantics = [#tpu.dimension_semantics<parallel>], iteration_bounds = array<i64: 2>, scalar_prefetch = 0 : i64, scratch_operands = 0 : i64, tpu.core_type = #tpu.core_type<tc>, window_params = [{transform_indices = @transform_0, window_bounds = array<i64: 16, 64>}, {pipeline_mode = #tpu.pipeline_mode<synchronous>, transform_indices = @transform_1, window_bounds = array<i64: 1, 64>}, {pipeline_mode = #tpu.pipeline_mode<synchronous>, transform_indices = @transform_2, window_bounds = array<i64: 64, 384>}, {pipeline_mode = #tpu.pipeline_mode<synchronous>, transform_indices = @transform_3, window_bounds = array<i64: 64, 64>}, {pipeline_mode = #tpu.pipeline_mode<synchronous>, transform_indices = @transform_4, window_bounds = array<i64: 1, 64>}, {pipeline_mode = #tpu.pipeline_mode<synchronous>, transform_indices = @transform_5, window_bounds = array<i64: 64, 256>}, {pipeline_mode = #tpu.pipeline_mode<synchronous>, transform_indices = @transform_6, window_bounds = array<i64: 128, 64>}, {pipeline_mode = #tpu.pipeline_mode<synchronous>, transform_indices = @transform_7, window_bounds = array<i64: 1, 64>}, {pipeline_mode = #tpu.pipeline_mode<synchronous>, transform_indices = @transform_8, window_bounds = array<i64: 64, 384>}, {pipeline_mode = #tpu.pipeline_mode<synchronous>, transform_indices = @transform_9, window_bounds = array<i64: 64, 64>}, {pipeline_mode = #tpu.pipeline_mode<synchronous>, transform_indices = @transform_10, window_bounds = array<i64: 1, 64>}, {pipeline_mode = #tpu.pipeline_mode<synchronous>, transform_indices = @transform_11, window_bounds = array<i64: 64, 256>}, {pipeline_mode = #tpu.pipeline_mode<synchronous>, transform_indices = @transform_12, window_bounds = array<i64: 128, 64>}, {pipeline_mode = #tpu.pipeline_mode<synchronous>, transform_indices = @transform_13, window_bounds = array<i64: 16, 128>}, {pipeline_mode = #tpu.pipeline_mode<synchronous>, transform_indices = @transform_14, window_bounds = array<i64: 16, 128>}, {pipeline_mode = #tpu.pipeline_mode<synchronous>, transform_indices = @transform_15, window_bounds = array<i64: 16, 16>}, {pipeline_mode = #tpu.pipeline_mode<synchronous>, transform_indices = @transform_16, window_bounds = array<i64: 1, 64>}, {pipeline_mode = #tpu.pipeline_mode<synchronous>, transform_indices = @transform_17, window_bounds = array<i64: 64, 256>}, {transform_indices = @transform_18, window_bounds = array<i64: 16, 1>}, {transform_indices = @transform_19, window_bounds = array<i64: 16, 1>}]} {
    %c0 = arith.constant 0 : index
    %c0_0 = arith.constant 0 : index
    %0 = vector.load %arg1[%c0, %c0_0] : memref<16x64xf32, #tpu.memory_space<vmem>>, vector<16x64xf32>
    %c0_1 = arith.constant 0 : index
    %c0_2 = arith.constant 0 : index
    %1 = vector.load %arg14[%c0_1, %c0_2] : memref<16x128xf32, #tpu.memory_space<vmem>>, vector<16x128xf32>
    %c0_3 = arith.constant 0 : index
    %c0_4 = arith.constant 0 : index
    %2 = vector.load %arg15[%c0_3, %c0_4] : memref<16x128xf32, #tpu.memory_space<vmem>>, vector<16x128xf32>
    %c0_5 = arith.constant 0 : index
    %c0_6 = arith.constant 0 : index
    %3 = vector.load %arg16[%c0_5, %c0_6] : memref<16x16xf32, #tpu.memory_space<vmem>>, vector<16x16xf32>
    %4 = arith.mulf %0, %0 : vector<16x64xf32>
    %cst = arith.constant dense<0.000000e+00> : vector<16xf32>
    %5 = vector.multi_reduction <add>, %4, %cst [1] : vector<16x64xf32> to vector<16xf32>
    %6 = vector.shape_cast %5 : vector<16xf32> to vector<16x1xf32>
    %cst_7 = arith.constant 6.400000e+01 : f32
    %7 = vector.broadcast %cst_7 : f32 to vector<16x1xf32>
    %8 = arith.divf %6, %7 : vector<16x1xf32>
    %cst_8 = arith.constant 9.99999997E-7 : f32
    %9 = vector.broadcast %cst_8 : f32 to vector<16x1xf32>
    %10 = arith.addf %8, %9 : vector<16x1xf32>
    %11 = math.rsqrt %10 : vector<16x1xf32>
    %12 = vector.broadcast %11 : vector<16x1xf32> to vector<16x64xf32>
    %13 = arith.mulf %0, %12 : vector<16x64xf32>
    %c0_9 = arith.constant 0 : index
    %c0_10 = arith.constant 0 : index
    %14 = vector.load %arg2[%c0_9, %c0_10] : memref<1x64xf32, #tpu.memory_space<vmem>>, vector<1x64xf32>
    %15 = vector.broadcast %14 : vector<1x64xf32> to vector<16x64xf32>
    %16 = arith.mulf %13, %15 : vector<16x64xf32>
    %17 = arith.truncf %16 : vector<16x64xf32> to vector<16x64xbf16>
    %c0_11 = arith.constant 0 : index
    %c0_12 = arith.constant 0 : index
    %18 = vector.load %arg3[%c0_11, %c0_12] : memref<64x384xbf16, #tpu.memory_space<vmem>>, vector<64x384xbf16>
    %cst_13 = arith.constant dense<0.000000e+00> : vector<16x384xf32>
    %19 = tpu.matmul %17, %18, %cst_13 {dimension_numbers = #tpu.dot_dimension_numbers<[1], [0], [0], [1], [0, 0, 1, 1], [], []>} : vector<16x64xbf16>, vector<64x384xbf16>, vector<16x384xf32> -> vector<16x384xf32>
    %20 = vector.extract_strided_slice %19 {offsets = [0, 0], sizes = [16, 128], strides = [1, 1]} : vector<16x384xf32> to vector<16x128xf32>
    %21 = arith.mulf %20, %1 : vector<16x128xf32>
    %22 = vector.extract_strided_slice %19 {offsets = [0, 128], sizes = [16, 128], strides = [1, 1]} : vector<16x384xf32> to vector<16x128xf32>
    %23 = arith.mulf %22, %2 : vector<16x128xf32>
    %24 = arith.addf %21, %23 : vector<16x128xf32>
    %25 = vector.extract_strided_slice %19 {offsets = [0, 256], sizes = [16, 128], strides = [1, 1]} : vector<16x384xf32> to vector<16x128xf32>
    %26 = arith.truncf %24 : vector<16x128xf32> to vector<16x128xbf16>
    %27 = arith.truncf %25 : vector<16x128xf32> to vector<16x128xbf16>
    %cst_14 = arith.constant 0.000000e+00 : f32
    %28 = vector.broadcast %cst_14 : f32 to vector<16x64xf32>
    %29 = vector.extract_strided_slice %26 {offsets = [0, 0], sizes = [16, 32], strides = [1, 1]} : vector<16x128xbf16> to vector<16x32xbf16>
    %30 = vector.extract_strided_slice %26 {offsets = [0, 64], sizes = [16, 32], strides = [1, 1]} : vector<16x128xbf16> to vector<16x32xbf16>
    %31 = vector.extract_strided_slice %27 {offsets = [0, 0], sizes = [16, 32], strides = [1, 1]} : vector<16x128xbf16> to vector<16x32xbf16>
    %cst_15 = arith.constant dense<0.000000e+00> : vector<16x16xf32>
    %32 = tpu.matmul %29, %30, %cst_15 {dimension_numbers = #tpu.dot_dimension_numbers<[1], [1], [0], [0], [0, 0, 1, 0], [], []>} : vector<16x32xbf16>, vector<16x32xbf16>, vector<16x16xf32> -> vector<16x16xf32>
    %cst_16 = arith.constant 0.176776692 : f32
    %33 = vector.broadcast %cst_16 : f32 to vector<16x16xf32>
    %34 = arith.mulf %32, %33 : vector<16x16xf32>
    %35 = arith.addf %34, %3 : vector<16x16xf32>
    %cst_17 = arith.constant dense<0xFF800000> : vector<16xf32>
    %36 = vector.multi_reduction <maximumf>, %35, %cst_17 [1] : vector<16x16xf32> to vector<16xf32>
    %37 = vector.shape_cast %36 : vector<16xf32> to vector<16x1xf32>
    %38 = vector.broadcast %37 : vector<16x1xf32> to vector<16x16xf32>
    %39 = arith.subf %35, %38 : vector<16x16xf32>
    %40 = math.exp %39 : vector<16x16xf32>
    %cst_18 = arith.constant dense<0.000000e+00> : vector<16xf32>
    %41 = vector.multi_reduction <add>, %40, %cst_18 [1] : vector<16x16xf32> to vector<16xf32>
    %42 = vector.shape_cast %41 : vector<16xf32> to vector<16x1xf32>
    %43 = tpu.reciprocal %42 {approx = true} : vector<16x1xf32> -> vector<16x1xf32>
    %44 = vector.broadcast %43 : vector<16x1xf32> to vector<16x16xf32>
    %45 = arith.mulf %40, %44 : vector<16x16xf32>
    %46 = arith.truncf %45 : vector<16x16xf32> to vector<16x16xbf16>
    %cst_19 = arith.constant dense<0.000000e+00> : vector<16x32xf32>
    %47 = tpu.matmul %46, %31, %cst_19 {dimension_numbers = #tpu.dot_dimension_numbers<[1], [0], [0], [1], [0, 0, 1, 1], [], []>} : vector<16x16xbf16>, vector<16x32xbf16>, vector<16x32xf32> -> vector<16x32xf32>
    %c0_20 = arith.constant 0 : index
    %c0_21 = arith.constant 0 : index
    %48 = vector.load %arg4[%c0_20, %c0_21] : memref<64x64xbf16, #tpu.memory_space<vmem>>, vector<32x64xbf16>
    %49 = arith.truncf %47 : vector<16x32xf32> to vector<16x32xbf16>
    %cst_22 = arith.constant dense<0.000000e+00> : vector<16x64xf32>
    %50 = tpu.matmul %49, %48, %cst_22 {dimension_numbers = #tpu.dot_dimension_numbers<[1], [0], [0], [1], [0, 0, 1, 1], [], []>} : vector<16x32xbf16>, vector<32x64xbf16>, vector<16x64xf32> -> vector<16x64xf32>
    %51 = arith.addf %28, %50 : vector<16x64xf32>
    %52 = vector.extract_strided_slice %26 {offsets = [0, 32], sizes = [16, 32], strides = [1, 1]} : vector<16x128xbf16> to vector<16x32xbf16>
    %53 = vector.extract_strided_slice %26 {offsets = [0, 96], sizes = [16, 32], strides = [1, 1]} : vector<16x128xbf16> to vector<16x32xbf16>
    %54 = vector.extract_strided_slice %27 {offsets = [0, 32], sizes = [16, 32], strides = [1, 1]} : vector<16x128xbf16> to vector<16x32xbf16>
    %cst_23 = arith.constant dense<0.000000e+00> : vector<16x16xf32>
    %55 = tpu.matmul %52, %53, %cst_23 {dimension_numbers = #tpu.dot_dimension_numbers<[1], [1], [0], [0], [0, 0, 1, 0], [], []>} : vector<16x32xbf16>, vector<16x32xbf16>, vector<16x16xf32> -> vector<16x16xf32>
    %cst_24 = arith.constant 0.176776692 : f32
    %56 = vector.broadcast %cst_24 : f32 to vector<16x16xf32>
    %57 = arith.mulf %55, %56 : vector<16x16xf32>
    %58 = arith.addf %57, %3 : vector<16x16xf32>
    %cst_25 = arith.constant dense<0xFF800000> : vector<16xf32>
    %59 = vector.multi_reduction <maximumf>, %58, %cst_25 [1] : vector<16x16xf32> to vector<16xf32>
    %60 = vector.shape_cast %59 : vector<16xf32> to vector<16x1xf32>
    %61 = vector.broadcast %60 : vector<16x1xf32> to vector<16x16xf32>
    %62 = arith.subf %58, %61 : vector<16x16xf32>
    %63 = math.exp %62 : vector<16x16xf32>
    %cst_26 = arith.constant dense<0.000000e+00> : vector<16xf32>
    %64 = vector.multi_reduction <add>, %63, %cst_26 [1] : vector<16x16xf32> to vector<16xf32>
    %65 = vector.shape_cast %64 : vector<16xf32> to vector<16x1xf32>
    %66 = tpu.reciprocal %65 {approx = true} : vector<16x1xf32> -> vector<16x1xf32>
    %67 = vector.broadcast %66 : vector<16x1xf32> to vector<16x16xf32>
    %68 = arith.mulf %63, %67 : vector<16x16xf32>
    %69 = arith.truncf %68 : vector<16x16xf32> to vector<16x16xbf16>
    %cst_27 = arith.constant dense<0.000000e+00> : vector<16x32xf32>
    %70 = tpu.matmul %69, %54, %cst_27 {dimension_numbers = #tpu.dot_dimension_numbers<[1], [0], [0], [1], [0, 0, 1, 1], [], []>} : vector<16x16xbf16>, vector<16x32xbf16>, vector<16x32xf32> -> vector<16x32xf32>
    %c32 = arith.constant 32 : index
    %c0_28 = arith.constant 0 : index
    %71 = vector.load %arg4[%c32, %c0_28] : memref<64x64xbf16, #tpu.memory_space<vmem>>, vector<32x64xbf16>
    %72 = arith.truncf %70 : vector<16x32xf32> to vector<16x32xbf16>
    %cst_29 = arith.constant dense<0.000000e+00> : vector<16x64xf32>
    %73 = tpu.matmul %72, %71, %cst_29 {dimension_numbers = #tpu.dot_dimension_numbers<[1], [0], [0], [1], [0, 0, 1, 1], [], []>} : vector<16x32xbf16>, vector<32x64xbf16>, vector<16x64xf32> -> vector<16x64xf32>
    %74 = arith.addf %51, %73 : vector<16x64xf32>
    %75 = arith.addf %0, %74 : vector<16x64xf32>
    %76 = arith.mulf %75, %75 : vector<16x64xf32>
    %cst_30 = arith.constant dense<0.000000e+00> : vector<16xf32>
    %77 = vector.multi_reduction <add>, %76, %cst_30 [1] : vector<16x64xf32> to vector<16xf32>
    %78 = vector.shape_cast %77 : vector<16xf32> to vector<16x1xf32>
    %cst_31 = arith.constant 6.400000e+01 : f32
    %79 = vector.broadcast %cst_31 : f32 to vector<16x1xf32>
    %80 = arith.divf %78, %79 : vector<16x1xf32>
    %cst_32 = arith.constant 9.99999997E-7 : f32
    %81 = vector.broadcast %cst_32 : f32 to vector<16x1xf32>
    %82 = arith.addf %80, %81 : vector<16x1xf32>
    %83 = math.rsqrt %82 : vector<16x1xf32>
    %84 = vector.broadcast %83 : vector<16x1xf32> to vector<16x64xf32>
    %85 = arith.mulf %75, %84 : vector<16x64xf32>
    %c0_33 = arith.constant 0 : index
    %c0_34 = arith.constant 0 : index
    %86 = vector.load %arg5[%c0_33, %c0_34] : memref<1x64xf32, #tpu.memory_space<vmem>>, vector<1x64xf32>
    %87 = vector.broadcast %86 : vector<1x64xf32> to vector<16x64xf32>
    %88 = arith.mulf %85, %87 : vector<16x64xf32>
    %89 = arith.truncf %88 : vector<16x64xf32> to vector<16x64xbf16>
    %c0_35 = arith.constant 0 : index
    %c0_36 = arith.constant 0 : index
    %90 = vector.load %arg6[%c0_35, %c0_36] : memref<64x256xbf16, #tpu.memory_space<vmem>>, vector<64x256xbf16>
    %cst_37 = arith.constant dense<0.000000e+00> : vector<16x256xf32>
    %91 = tpu.matmul %89, %90, %cst_37 {dimension_numbers = #tpu.dot_dimension_numbers<[1], [0], [0], [1], [0, 0, 1, 1], [], []>} : vector<16x64xbf16>, vector<64x256xbf16>, vector<16x256xf32> -> vector<16x256xf32>
    %92 = vector.extract_strided_slice %91 {offsets = [0, 0], sizes = [16, 128], strides = [1, 1]} : vector<16x256xf32> to vector<16x128xf32>
    %93 = vector.extract_strided_slice %91 {offsets = [0, 128], sizes = [16, 128], strides = [1, 1]} : vector<16x256xf32> to vector<16x128xf32>
    %94 = arith.negf %92 : vector<16x128xf32>
    %95 = math.exp %94 : vector<16x128xf32>
    %cst_38 = arith.constant 1.000000e+00 : f32
    %96 = vector.broadcast %cst_38 : f32 to vector<16x128xf32>
    %97 = arith.addf %96, %95 : vector<16x128xf32>
    %98 = arith.divf %96, %97 : vector<16x128xf32>
    %99 = arith.mulf %92, %98 : vector<16x128xf32>
    %100 = arith.mulf %99, %93 : vector<16x128xf32>
    %101 = arith.truncf %100 : vector<16x128xf32> to vector<16x128xbf16>
    %c0_39 = arith.constant 0 : index
    %c0_40 = arith.constant 0 : index
    %102 = vector.load %arg7[%c0_39, %c0_40] : memref<128x64xbf16, #tpu.memory_space<vmem>>, vector<128x64xbf16>
    %cst_41 = arith.constant dense<0.000000e+00> : vector<16x64xf32>
    %103 = tpu.matmul %101, %102, %cst_41 {dimension_numbers = #tpu.dot_dimension_numbers<[1], [0], [0], [1], [0, 0, 1, 1], [], []>} : vector<16x128xbf16>, vector<128x64xbf16>, vector<16x64xf32> -> vector<16x64xf32>
    %104 = arith.addf %75, %103 : vector<16x64xf32>
    %105 = arith.mulf %104, %104 : vector<16x64xf32>
    %cst_42 = arith.constant dense<0.000000e+00> : vector<16xf32>
    %106 = vector.multi_reduction <add>, %105, %cst_42 [1] : vector<16x64xf32> to vector<16xf32>
    %107 = vector.shape_cast %106 : vector<16xf32> to vector<16x1xf32>
    %cst_43 = arith.constant 6.400000e+01 : f32
    %108 = vector.broadcast %cst_43 : f32 to vector<16x1xf32>
    %109 = arith.divf %107, %108 : vector<16x1xf32>
    %cst_44 = arith.constant 9.99999997E-7 : f32
    %110 = vector.broadcast %cst_44 : f32 to vector<16x1xf32>
    %111 = arith.addf %109, %110 : vector<16x1xf32>
    %112 = math.rsqrt %111 : vector<16x1xf32>
    %113 = vector.broadcast %112 : vector<16x1xf32> to vector<16x64xf32>
    %114 = arith.mulf %104, %113 : vector<16x64xf32>
    %c0_45 = arith.constant 0 : index
    %c0_46 = arith.constant 0 : index
    %115 = vector.load %arg8[%c0_45, %c0_46] : memref<1x64xf32, #tpu.memory_space<vmem>>, vector<1x64xf32>
    %116 = vector.broadcast %115 : vector<1x64xf32> to vector<16x64xf32>
    %117 = arith.mulf %114, %116 : vector<16x64xf32>
    %118 = arith.truncf %117 : vector<16x64xf32> to vector<16x64xbf16>
    %c0_47 = arith.constant 0 : index
    %c0_48 = arith.constant 0 : index
    %119 = vector.load %arg9[%c0_47, %c0_48] : memref<64x384xbf16, #tpu.memory_space<vmem>>, vector<64x384xbf16>
    %cst_49 = arith.constant dense<0.000000e+00> : vector<16x384xf32>
    %120 = tpu.matmul %118, %119, %cst_49 {dimension_numbers = #tpu.dot_dimension_numbers<[1], [0], [0], [1], [0, 0, 1, 1], [], []>} : vector<16x64xbf16>, vector<64x384xbf16>, vector<16x384xf32> -> vector<16x384xf32>
    %121 = vector.extract_strided_slice %120 {offsets = [0, 0], sizes = [16, 128], strides = [1, 1]} : vector<16x384xf32> to vector<16x128xf32>
    %122 = arith.mulf %121, %1 : vector<16x128xf32>
    %123 = vector.extract_strided_slice %120 {offsets = [0, 128], sizes = [16, 128], strides = [1, 1]} : vector<16x384xf32> to vector<16x128xf32>
    %124 = arith.mulf %123, %2 : vector<16x128xf32>
    %125 = arith.addf %122, %124 : vector<16x128xf32>
    %126 = vector.extract_strided_slice %120 {offsets = [0, 256], sizes = [16, 128], strides = [1, 1]} : vector<16x384xf32> to vector<16x128xf32>
    %127 = arith.truncf %125 : vector<16x128xf32> to vector<16x128xbf16>
    %128 = arith.truncf %126 : vector<16x128xf32> to vector<16x128xbf16>
    %cst_50 = arith.constant 0.000000e+00 : f32
    %129 = vector.broadcast %cst_50 : f32 to vector<16x64xf32>
    %130 = vector.extract_strided_slice %127 {offsets = [0, 0], sizes = [16, 32], strides = [1, 1]} : vector<16x128xbf16> to vector<16x32xbf16>
    %131 = vector.extract_strided_slice %127 {offsets = [0, 64], sizes = [16, 32], strides = [1, 1]} : vector<16x128xbf16> to vector<16x32xbf16>
    %132 = vector.extract_strided_slice %128 {offsets = [0, 0], sizes = [16, 32], strides = [1, 1]} : vector<16x128xbf16> to vector<16x32xbf16>
    %cst_51 = arith.constant dense<0.000000e+00> : vector<16x16xf32>
    %133 = tpu.matmul %130, %131, %cst_51 {dimension_numbers = #tpu.dot_dimension_numbers<[1], [1], [0], [0], [0, 0, 1, 0], [], []>} : vector<16x32xbf16>, vector<16x32xbf16>, vector<16x16xf32> -> vector<16x16xf32>
    %cst_52 = arith.constant 0.176776692 : f32
    %134 = vector.broadcast %cst_52 : f32 to vector<16x16xf32>
    %135 = arith.mulf %133, %134 : vector<16x16xf32>
    %136 = arith.addf %135, %3 : vector<16x16xf32>
    %cst_53 = arith.constant dense<0xFF800000> : vector<16xf32>
    %137 = vector.multi_reduction <maximumf>, %136, %cst_53 [1] : vector<16x16xf32> to vector<16xf32>
    %138 = vector.shape_cast %137 : vector<16xf32> to vector<16x1xf32>
    %139 = vector.broadcast %138 : vector<16x1xf32> to vector<16x16xf32>
    %140 = arith.subf %136, %139 : vector<16x16xf32>
    %141 = math.exp %140 : vector<16x16xf32>
    %cst_54 = arith.constant dense<0.000000e+00> : vector<16xf32>
    %142 = vector.multi_reduction <add>, %141, %cst_54 [1] : vector<16x16xf32> to vector<16xf32>
    %143 = vector.shape_cast %142 : vector<16xf32> to vector<16x1xf32>
    %144 = tpu.reciprocal %143 {approx = true} : vector<16x1xf32> -> vector<16x1xf32>
    %145 = vector.broadcast %144 : vector<16x1xf32> to vector<16x16xf32>
    %146 = arith.mulf %141, %145 : vector<16x16xf32>
    %147 = arith.truncf %146 : vector<16x16xf32> to vector<16x16xbf16>
    %cst_55 = arith.constant dense<0.000000e+00> : vector<16x32xf32>
    %148 = tpu.matmul %147, %132, %cst_55 {dimension_numbers = #tpu.dot_dimension_numbers<[1], [0], [0], [1], [0, 0, 1, 1], [], []>} : vector<16x16xbf16>, vector<16x32xbf16>, vector<16x32xf32> -> vector<16x32xf32>
    %c0_56 = arith.constant 0 : index
    %c0_57 = arith.constant 0 : index
    %149 = vector.load %arg10[%c0_56, %c0_57] : memref<64x64xbf16, #tpu.memory_space<vmem>>, vector<32x64xbf16>
    %150 = arith.truncf %148 : vector<16x32xf32> to vector<16x32xbf16>
    %cst_58 = arith.constant dense<0.000000e+00> : vector<16x64xf32>
    %151 = tpu.matmul %150, %149, %cst_58 {dimension_numbers = #tpu.dot_dimension_numbers<[1], [0], [0], [1], [0, 0, 1, 1], [], []>} : vector<16x32xbf16>, vector<32x64xbf16>, vector<16x64xf32> -> vector<16x64xf32>
    %152 = arith.addf %129, %151 : vector<16x64xf32>
    %153 = vector.extract_strided_slice %127 {offsets = [0, 32], sizes = [16, 32], strides = [1, 1]} : vector<16x128xbf16> to vector<16x32xbf16>
    %154 = vector.extract_strided_slice %127 {offsets = [0, 96], sizes = [16, 32], strides = [1, 1]} : vector<16x128xbf16> to vector<16x32xbf16>
    %155 = vector.extract_strided_slice %128 {offsets = [0, 32], sizes = [16, 32], strides = [1, 1]} : vector<16x128xbf16> to vector<16x32xbf16>
    %cst_59 = arith.constant dense<0.000000e+00> : vector<16x16xf32>
    %156 = tpu.matmul %153, %154, %cst_59 {dimension_numbers = #tpu.dot_dimension_numbers<[1], [1], [0], [0], [0, 0, 1, 0], [], []>} : vector<16x32xbf16>, vector<16x32xbf16>, vector<16x16xf32> -> vector<16x16xf32>
    %cst_60 = arith.constant 0.176776692 : f32
    %157 = vector.broadcast %cst_60 : f32 to vector<16x16xf32>
    %158 = arith.mulf %156, %157 : vector<16x16xf32>
    %159 = arith.addf %158, %3 : vector<16x16xf32>
    %cst_61 = arith.constant dense<0xFF800000> : vector<16xf32>
    %160 = vector.multi_reduction <maximumf>, %159, %cst_61 [1] : vector<16x16xf32> to vector<16xf32>
    %161 = vector.shape_cast %160 : vector<16xf32> to vector<16x1xf32>
    %162 = vector.broadcast %161 : vector<16x1xf32> to vector<16x16xf32>
    %163 = arith.subf %159, %162 : vector<16x16xf32>
    %164 = math.exp %163 : vector<16x16xf32>
    %cst_62 = arith.constant dense<0.000000e+00> : vector<16xf32>
    %165 = vector.multi_reduction <add>, %164, %cst_62 [1] : vector<16x16xf32> to vector<16xf32>
    %166 = vector.shape_cast %165 : vector<16xf32> to vector<16x1xf32>
    %167 = tpu.reciprocal %166 {approx = true} : vector<16x1xf32> -> vector<16x1xf32>
    %168 = vector.broadcast %167 : vector<16x1xf32> to vector<16x16xf32>
    %169 = arith.mulf %164, %168 : vector<16x16xf32>
    %170 = arith.truncf %169 : vector<16x16xf32> to vector<16x16xbf16>
    %cst_63 = arith.constant dense<0.000000e+00> : vector<16x32xf32>
    %171 = tpu.matmul %170, %155, %cst_63 {dimension_numbers = #tpu.dot_dimension_numbers<[1], [0], [0], [1], [0, 0, 1, 1], [], []>} : vector<16x16xbf16>, vector<16x32xbf16>, vector<16x32xf32> -> vector<16x32xf32>
    %c32_64 = arith.constant 32 : index
    %c0_65 = arith.constant 0 : index
    %172 = vector.load %arg10[%c32_64, %c0_65] : memref<64x64xbf16, #tpu.memory_space<vmem>>, vector<32x64xbf16>
    %173 = arith.truncf %171 : vector<16x32xf32> to vector<16x32xbf16>
    %cst_66 = arith.constant dense<0.000000e+00> : vector<16x64xf32>
    %174 = tpu.matmul %173, %172, %cst_66 {dimension_numbers = #tpu.dot_dimension_numbers<[1], [0], [0], [1], [0, 0, 1, 1], [], []>} : vector<16x32xbf16>, vector<32x64xbf16>, vector<16x64xf32> -> vector<16x64xf32>
    %175 = arith.addf %152, %174 : vector<16x64xf32>
    %176 = arith.addf %104, %175 : vector<16x64xf32>
    %177 = arith.mulf %176, %176 : vector<16x64xf32>
    %cst_67 = arith.constant dense<0.000000e+00> : vector<16xf32>
    %178 = vector.multi_reduction <add>, %177, %cst_67 [1] : vector<16x64xf32> to vector<16xf32>
    %179 = vector.shape_cast %178 : vector<16xf32> to vector<16x1xf32>
    %cst_68 = arith.constant 6.400000e+01 : f32
    %180 = vector.broadcast %cst_68 : f32 to vector<16x1xf32>
    %181 = arith.divf %179, %180 : vector<16x1xf32>
    %cst_69 = arith.constant 9.99999997E-7 : f32
    %182 = vector.broadcast %cst_69 : f32 to vector<16x1xf32>
    %183 = arith.addf %181, %182 : vector<16x1xf32>
    %184 = math.rsqrt %183 : vector<16x1xf32>
    %185 = vector.broadcast %184 : vector<16x1xf32> to vector<16x64xf32>
    %186 = arith.mulf %176, %185 : vector<16x64xf32>
    %c0_70 = arith.constant 0 : index
    %c0_71 = arith.constant 0 : index
    %187 = vector.load %arg11[%c0_70, %c0_71] : memref<1x64xf32, #tpu.memory_space<vmem>>, vector<1x64xf32>
    %188 = vector.broadcast %187 : vector<1x64xf32> to vector<16x64xf32>
    %189 = arith.mulf %186, %188 : vector<16x64xf32>
    %190 = arith.truncf %189 : vector<16x64xf32> to vector<16x64xbf16>
    %c0_72 = arith.constant 0 : index
    %c0_73 = arith.constant 0 : index
    %191 = vector.load %arg12[%c0_72, %c0_73] : memref<64x256xbf16, #tpu.memory_space<vmem>>, vector<64x256xbf16>
    %cst_74 = arith.constant dense<0.000000e+00> : vector<16x256xf32>
    %192 = tpu.matmul %190, %191, %cst_74 {dimension_numbers = #tpu.dot_dimension_numbers<[1], [0], [0], [1], [0, 0, 1, 1], [], []>} : vector<16x64xbf16>, vector<64x256xbf16>, vector<16x256xf32> -> vector<16x256xf32>
    %193 = vector.extract_strided_slice %192 {offsets = [0, 0], sizes = [16, 128], strides = [1, 1]} : vector<16x256xf32> to vector<16x128xf32>
    %194 = vector.extract_strided_slice %192 {offsets = [0, 128], sizes = [16, 128], strides = [1, 1]} : vector<16x256xf32> to vector<16x128xf32>
    %195 = arith.negf %193 : vector<16x128xf32>
    %196 = math.exp %195 : vector<16x128xf32>
    %cst_75 = arith.constant 1.000000e+00 : f32
    %197 = vector.broadcast %cst_75 : f32 to vector<16x128xf32>
    %198 = arith.addf %197, %196 : vector<16x128xf32>
    %199 = arith.divf %197, %198 : vector<16x128xf32>
    %200 = arith.mulf %193, %199 : vector<16x128xf32>
    %201 = arith.mulf %200, %194 : vector<16x128xf32>
    %202 = arith.truncf %201 : vector<16x128xf32> to vector<16x128xbf16>
    %c0_76 = arith.constant 0 : index
    %c0_77 = arith.constant 0 : index
    %203 = vector.load %arg13[%c0_76, %c0_77] : memref<128x64xbf16, #tpu.memory_space<vmem>>, vector<128x64xbf16>
    %cst_78 = arith.constant dense<0.000000e+00> : vector<16x64xf32>
    %204 = tpu.matmul %202, %203, %cst_78 {dimension_numbers = #tpu.dot_dimension_numbers<[1], [0], [0], [1], [0, 0, 1, 1], [], []>} : vector<16x128xbf16>, vector<128x64xbf16>, vector<16x64xf32> -> vector<16x64xf32>
    %205 = arith.addf %176, %204 : vector<16x64xf32>
    %206 = arith.mulf %205, %205 : vector<16x64xf32>
    %cst_79 = arith.constant dense<0.000000e+00> : vector<16xf32>
    %207 = vector.multi_reduction <add>, %206, %cst_79 [1] : vector<16x64xf32> to vector<16xf32>
    %208 = vector.shape_cast %207 : vector<16xf32> to vector<16x1xf32>
    %cst_80 = arith.constant 6.400000e+01 : f32
    %209 = vector.broadcast %cst_80 : f32 to vector<16x1xf32>
    %210 = arith.divf %208, %209 : vector<16x1xf32>
    %cst_81 = arith.constant 9.99999997E-7 : f32
    %211 = vector.broadcast %cst_81 : f32 to vector<16x1xf32>
    %212 = arith.addf %210, %211 : vector<16x1xf32>
    %213 = math.rsqrt %212 : vector<16x1xf32>
    %214 = vector.broadcast %213 : vector<16x1xf32> to vector<16x64xf32>
    %215 = arith.mulf %205, %214 : vector<16x64xf32>
    %c0_82 = arith.constant 0 : index
    %c0_83 = arith.constant 0 : index
    %216 = vector.load %arg17[%c0_82, %c0_83] : memref<1x64xf32, #tpu.memory_space<vmem>>, vector<1x64xf32>
    %217 = vector.broadcast %216 : vector<1x64xf32> to vector<16x64xf32>
    %218 = arith.mulf %215, %217 : vector<16x64xf32>
    %219 = arith.truncf %218 : vector<16x64xf32> to vector<16x64xbf16>
    %c0_84 = arith.constant 0 : index
    %c0_85 = arith.constant 0 : index
    %220 = vector.load %arg18[%c0_84, %c0_85] : memref<64x256xbf16, #tpu.memory_space<vmem>>, vector<64x256xbf16>
    %cst_86 = arith.constant dense<0.000000e+00> : vector<16x256xf32>
    %221 = tpu.matmul %219, %220, %cst_86 {dimension_numbers = #tpu.dot_dimension_numbers<[1], [0], [0], [1], [0, 0, 1, 1], [], []>} : vector<16x64xbf16>, vector<64x256xbf16>, vector<16x256xf32> -> vector<16x256xf32>
    %c0_87 = arith.constant 0 : index
    %c0_88 = arith.constant 0 : index
    %222 = vector.load %arg19[%c0_87, %c0_88] : memref<16x1xi32, #tpu.memory_space<vmem>>, vector<16x1xi32>
    %cst_89 = arith.constant dense<0xFF800000> : vector<16xf32>
    %223 = vector.multi_reduction <maximumf>, %221, %cst_89 [1] : vector<16x256xf32> to vector<16xf32>
    %224 = vector.shape_cast %223 : vector<16xf32> to vector<16x1xf32>
    %225 = vector.broadcast %224 : vector<16x1xf32> to vector<16x256xf32>
    %226 = arith.subf %221, %225 : vector<16x256xf32>
    %227 = math.exp %226 : vector<16x256xf32>
    %cst_90 = arith.constant dense<0.000000e+00> : vector<16xf32>
    %228 = vector.multi_reduction <add>, %227, %cst_90 [1] : vector<16x256xf32> to vector<16xf32>
    %229 = vector.shape_cast %228 : vector<16xf32> to vector<16x1xf32>
    %230 = math.log %229 : vector<16x1xf32>
    %231 = tpu.iota {dimensions = array<i32: 1>} : vector<16x256xi32>
    %c-100_i32 = arith.constant -100 : i32
    %232 = vector.broadcast %c-100_i32 : i32 to vector<16x1xi32>
    %233 = arith.cmpi ne, %222, %232 : vector<16x1xi32>
    %234 = vector.broadcast %222 : vector<16x1xi32> to vector<16x256xi32>
    %235 = arith.cmpi eq, %231, %234 : vector<16x256xi32>
    %236 = vector.broadcast %233 : vector<16x1xi1> to vector<16x256xi1>
    %237 = arith.andi %235, %236 : vector<16x256xi1>
    %cst_91 = arith.constant 0.000000e+00 : f32
    %238 = vector.broadcast %cst_91 : f32 to vector<16x256xf32>
    %239 = arith.select %237, %226, %238 : vector<16x256xi1>, vector<16x256xf32>
    %cst_92 = arith.constant dense<0.000000e+00> : vector<16xf32>
    %240 = vector.multi_reduction <add>, %239, %cst_92 [1] : vector<16x256xf32> to vector<16xf32>
    %241 = vector.shape_cast %240 : vector<16xf32> to vector<16x1xf32>
    %242 = arith.subf %230, %241 : vector<16x1xf32>
    %243 = arith.extui %233 : vector<16x1xi1> to vector<16x1xi32>
    %244 = arith.sitofp %243 : vector<16x1xi32> to vector<16x1xf32>
    %245 = arith.mulf %242, %244 : vector<16x1xf32>
    %c0_93 = arith.constant 0 : index
    %c0_94 = arith.constant 0 : index
    %246 = vector.load %arg20[%c0_93, %c0_94] : memref<16x1xf32, #tpu.memory_space<vmem>>, vector<16x1xf32>
    tpu.vector_store %arg20[%c0_93, %c0_94], %245 {strides = array<i32>} : memref<16x1xf32, #tpu.memory_space<vmem>>, vector<16x1xf32>,
    return
  }
  func.func @transform_0(%arg0: i32) -> (i32, i32) {
    %c0_i32 = arith.constant 0 : i32
    %c0_i32_0 = arith.constant 0 : i32
    return %arg0, %c0_i32 : i32, i32
  }
  func.func @transform_1(%arg0: i32) -> (i32, i32) {
    %c0_i32 = arith.constant 0 : i32
    %c0_i32_0 = arith.constant 0 : i32
    %c0_i32_1 = arith.constant 0 : i32
    return %c0_i32, %c0_i32_0 : i32, i32
  }
  func.func @transform_2(%arg0: i32) -> (i32, i32) {
    %c0_i32 = arith.constant 0 : i32
    %c0_i32_0 = arith.constant 0 : i32
    %c0_i32_1 = arith.constant 0 : i32
    return %c0_i32, %c0_i32_0 : i32, i32
  }
  func.func @transform_3(%arg0: i32) -> (i32, i32) {
    %c0_i32 = arith.constant 0 : i32
    %c0_i32_0 = arith.constant 0 : i32
    %c0_i32_1 = arith.constant 0 : i32
    return %c0_i32, %c0_i32_0 : i32, i32
  }
  func.func @transform_4(%arg0: i32) -> (i32, i32) {
    %c0_i32 = arith.constant 0 : i32
    %c0_i32_0 = arith.constant 0 : i32
    %c0_i32_1 = arith.constant 0 : i32
    return %c0_i32, %c0_i32_0 : i32, i32
  }
  func.func @transform_5(%arg0: i32) -> (i32, i32) {
    %c0_i32 = arith.constant 0 : i32
    %c0_i32_0 = arith.constant 0 : i32
    %c0_i32_1 = arith.constant 0 : i32
    return %c0_i32, %c0_i32_0 : i32, i32
  }
  func.func @transform_6(%arg0: i32) -> (i32, i32) {
    %c0_i32 = arith.constant 0 : i32
    %c0_i32_0 = arith.constant 0 : i32
    %c0_i32_1 = arith.constant 0 : i32
    return %c0_i32, %c0_i32_0 : i32, i32
  }
  func.func @transform_7(%arg0: i32) -> (i32, i32) {
    %c0_i32 = arith.constant 0 : i32
    %c0_i32_0 = arith.constant 0 : i32
    %c0_i32_1 = arith.constant 0 : i32
    return %c0_i32, %c0_i32_0 : i32, i32
  }
  func.func @transform_8(%arg0: i32) -> (i32, i32) {
    %c0_i32 = arith.constant 0 : i32
    %c0_i32_0 = arith.constant 0 : i32
    %c0_i32_1 = arith.constant 0 : i32
    return %c0_i32, %c0_i32_0 : i32, i32
  }
  func.func @transform_9(%arg0: i32) -> (i32, i32) {
    %c0_i32 = arith.constant 0 : i32
    %c0_i32_0 = arith.constant 0 : i32
    %c0_i32_1 = arith.constant 0 : i32
    return %c0_i32, %c0_i32_0 : i32, i32
  }
  func.func @transform_10(%arg0: i32) -> (i32, i32) {
    %c0_i32 = arith.constant 0 : i32
    %c0_i32_0 = arith.constant 0 : i32
    %c0_i32_1 = arith.constant 0 : i32
    return %c0_i32, %c0_i32_0 : i32, i32
  }
  func.func @transform_11(%arg0: i32) -> (i32, i32) {
    %c0_i32 = arith.constant 0 : i32
    %c0_i32_0 = arith.constant 0 : i32
    %c0_i32_1 = arith.constant 0 : i32
    return %c0_i32, %c0_i32_0 : i32, i32
  }
  func.func @transform_12(%arg0: i32) -> (i32, i32) {
    %c0_i32 = arith.constant 0 : i32
    %c0_i32_0 = arith.constant 0 : i32
    %c0_i32_1 = arith.constant 0 : i32
    return %c0_i32, %c0_i32_0 : i32, i32
  }
  func.func @transform_13(%arg0: i32) -> (i32, i32) {
    %c0_i32 = arith.constant 0 : i32
    %c0_i32_0 = arith.constant 0 : i32
    %c0_i32_1 = arith.constant 0 : i32
    return %c0_i32, %c0_i32_0 : i32, i32
  }
  func.func @transform_14(%arg0: i32) -> (i32, i32) {
    %c0_i32 = arith.constant 0 : i32
    %c0_i32_0 = arith.constant 0 : i32
    %c0_i32_1 = arith.constant 0 : i32
    return %c0_i32, %c0_i32_0 : i32, i32
  }
  func.func @transform_15(%arg0: i32) -> (i32, i32) {
    %c0_i32 = arith.constant 0 : i32
    %c0_i32_0 = arith.constant 0 : i32
    %c0_i32_1 = arith.constant 0 : i32
    return %c0_i32, %c0_i32_0 : i32, i32
  }
  func.func @transform_16(%arg0: i32) -> (i32, i32) {
    %c0_i32 = arith.constant 0 : i32
    %c0_i32_0 = arith.constant 0 : i32
    %c0_i32_1 = arith.constant 0 : i32
    return %c0_i32, %c0_i32_0 : i32, i32
  }
  func.func @transform_17(%arg0: i32) -> (i32, i32) {
    %c0_i32 = arith.constant 0 : i32
    %c0_i32_0 = arith.constant 0 : i32
    %c0_i32_1 = arith.constant 0 : i32
    return %c0_i32, %c0_i32_0 : i32, i32
  }
  func.func @transform_18(%arg0: i32) -> (i32, i32) {
    %c0_i32 = arith.constant 0 : i32
    %c0_i32_0 = arith.constant 0 : i32
    return %arg0, %c0_i32 : i32, i32
  }
  func.func @transform_19(%arg0: i32) -> (i32, i32) {
    %c0_i32 = arith.constant 0 : i32
    %c0_i32_0 = arith.constant 0 : i32
    return %arg0, %c0_i32 : i32, i32
  }
}

</mosaic_0001>

<bundles_post_ra>
// kernel: tile.14
= control target key start
LH: loop header
LB: loop body
LE: loop exit
PB: predicated region body
PF: predicated region fallthrough
CT: control target
= control target key end

     0   :  { %vm83_vm0 = vcmask 1047556   ;;  %vm85_vm1 = vcmask 261120   ;;  %s196_s9 = smov 96   ;;  %s197_s14 = smov 32   ;;  %vm104_vm2 = vcmask 1048320   ;;  %vm125_vm3 = vcmask 785920   ;;  %s290_s0 = inlined_call_operand.vmem [shape: f32[16,4,32], index: 0, kind: input, shape index: {}]   ;;  %s291_s1 = inlined_call_operand.vmem [shape: f32[16,128], index: 1, kind: output, shape index: {}]  }
   0x1   :  { %v181_v0 = vld [vmem:[%s290_s0 + $0x1c] sm:$0xf]  ;;  %v182_v1 = vld [vmem:[%s290_s0 + $0x18] sm:$0xf]  ;;  %v183_v2 = vld [vmem:[%s290_s0 + $0x14] sm:$0xf] }
   0x2   :  { %49 = vst [vmem:[#allocation0 + $0x38] sm:$0xf] %v181_v0  ;;  %54 = vst [vmem:[#allocation0 + $0x30] sm:$0xf] %v182_v1  ;;  %v184_v3 = vld [vmem:[%s290_s0 + $0x10] sm:$0xf] }
   0x3   :  { %59 = vst [vmem:[#allocation0 + $0x28] sm:$0xf] %v183_v2  ;;  %v185_v4 = vld [vmem:[%s290_s0 + $0xc] sm:$0xf]  ;;  %v186_v5 = vld [vmem:[%s290_s0 + $0x8] sm:$0xf] }
   0x4   :  { %64 = vst [vmem:[#allocation0 + $0x20] sm:$0xf] %v184_v3  ;;  %69 = vst [vmem:[#allocation0 + $0x18] sm:$0xf] %v185_v4  ;;  %v187_v6 = vld [vmem:[%s290_s0 + $0x4] sm:$0xf] }
   0x5   :  { %74 = vst [vmem:[#allocation0 + $0x10] sm:$0xf] %v186_v5  ;;  %v79_v7 = vld [vmem:[%s290_s0] sm:$0xf]  ;;  %78 = vst [vmem:[#allocation0 + $0x8] sm:$0xf] %v187_v6 }
   0x6   :  { %80 = vst [vmem:[#allocation0] sm:$0xf] %v79_v7  ;;  %v173_v8 = vld [vmem:[%s290_s0 + $0x3c] sm:$0xf]  ;;  %v174_v9 = vld [vmem:[%s290_s0 + $0x38] sm:$0xf] }
   0x7   :  { %9 = vst [vmem:[#allocation0 + $0x78] sm:$0xf] %v173_v8  ;;  %14 = vst [vmem:[#allocation0 + $0x70] sm:$0xf] %v174_v9  ;;  %v175_v10 = vld [vmem:[%s290_s0 + $0x34] sm:$0xf] }
   0x8   :  { %v176_v11 = vld [vmem:[%s290_s0 + $0x30] sm:$0xf]  ;;  %v177_v12 = vld [vmem:[%s290_s0 + $0x2c] sm:$0xf]  ;;  %19 = vst [vmem:[#allocation0 + $0x68] sm:$0xf] %v175_v10 }
   0x9   :  { %24 = vst [vmem:[#allocation0 + $0x60] sm:$0xf] %v176_v11  ;;  %29 = vst [vmem:[#allocation0 + $0x58] sm:$0xf] %v177_v12  ;;  %v178_v13 = vld [vmem:[%s290_s0 + $0x28] sm:$0xf] }
   0xa   :  { %v179_v14 = vld [vmem:[%s290_s0 + $0x24] sm:$0xf]  ;;  %v180_v15 = vld [vmem:[%s290_s0 + $0x20] sm:$0xf]  ;;  %34 = vst [vmem:[#allocation0 + $0x50] sm:$0xf] %v178_v13 }
   0xb   :  { %39 = vst [vmem:[#allocation0 + $0x48] sm:$0xf] %v179_v14  ;;  %44 = vst [vmem:[#allocation0 + $0x40] sm:$0xf] %v180_v15  ;;  %s195_s0 = smov 64   ;;  %vm146_vm4 = vcmask 523520  }
   0xc   :  { %v120_v16 = vld [vmem:[#allocation0 + $0x2] ss:$8 sm:$0xf0]   ;;  %v99_v17 = vld [vmem:[#allocation0 + $0x3] ss:$8 sm:$0xf0]  }
   0xd   :  { %v118_v18 = vld [vmem:[#allocation0 + $0x2] ss:$8 sm:$0xf]   ;;  %v97_v19 = vld [vmem:[#allocation0 + $0x3] ss:$8 sm:$0xf]  }
   0xe   :  { %v122_v20 = vsel %vm83_vm0, %v120_v16, %v118_v18  ;;  %v101_v21 = vsel %vm83_vm0, %v99_v17, %v97_v19  ;;  %v139_v24 = vld [vmem:[#allocation0 + $0x1] ss:$8 sm:$0xf]   ;;  %v81_v32 = vld [vmem:[#allocation0] ss:$8 sm:$0xf]  }
   0xf   :  { %123 = vrot.lane.b32.xlu1 %v122_v20, %s195_s0  ;;  %102 = vrot.lane.b32.xlu0 %v101_v21, %s196_s9  ;;  %v141_v25 = vld [vmem:[#allocation0 + $0x1] ss:$8 sm:$0xf0]   ;;  %v82_v33 = vld [vmem:[#allocation0] ss:$8 sm:$0xf0]  }
  0x10   :  { %v130_v22 = vld [vmem:[#allocation0 + $0x42] ss:$8 sm:$0xf0]   ;;  %v109_v23 = vld [vmem:[#allocation0 + $0x43] ss:$8 sm:$0xf0]   ;;  %v84_v34 = vsel %vm83_vm0, %v82_v33, %v81_v32  ;;  %v143_v38 = vsel %vm83_vm0, %v141_v25, %v139_v24 }
  0x11   :  { %v151_v31 = vld [vmem:[#allocation0 + $0x41] ss:$8 sm:$0xf0]   ;;  %v90_v36 = vld [vmem:[#allocation0 + $0x40] ss:$8 sm:$0xf0]  }
  0x12   :  { %v128_v26 = vld [vmem:[#allocation0 + $0x42] ss:$8 sm:$0xf]   ;;  %v107_v27 = vld [vmem:[#allocation0 + $0x43] ss:$8 sm:$0xf]  }
  0x13   :  { %v132_v28 = vsel %vm83_vm0, %v130_v22, %v128_v26  ;;  %v111_v29 = vsel %vm83_vm0, %v109_v23, %v107_v27  ;;  %v149_v30 = vld [vmem:[#allocation0 + $0x41] ss:$8 sm:$0xf]   ;;  %v88_v35 = vld [vmem:[#allocation0 + $0x40] ss:$8 sm:$0xf]  }
  0x14   :  { %133 = vrot.lane.b32.xlu1 %v132_v28, %s195_s0  ;;  %112 = vrot.lane.b32.xlu0 %v111_v29, %s196_s9  ;;  %v153_v37 = vsel %vm83_vm0, %v151_v31, %v149_v30  ;;  %86 = vst.msk [vmem:[%s291_s1] sm:$0xff] %vm85_vm1, %v84_v34   ;;  %v92_v39 = vsel %vm83_vm0, %v90_v36, %v88_v35 }
  0x15   :  { %188 = vst.msk [vmem:[%s291_s1 + $0x8] sm:$0xff] %vm85_vm1, %v92_v39  }
  0x18   :  { %154 = vrot.lane.b32.xlu1 %v153_v37, %s197_s14  ;;  %144 = vrot.lane.b32.xlu0 %v143_v38, %s197_s14 }
  0x81   :  { %v124_v40 = vpop.permute.xlu1 %123   ;;  %v103_v41 = vpop.permute.xlu0 %102  }
  0x82   :  { %105 = vst.msk [vmem:[%s291_s1] sm:$0xff] %vm104_vm2, %v103_v41  }
  0x83   :  { %126 = vst.msk [vmem:[%s291_s1] sm:$0xff] %vm125_vm3, %v124_v40  }
  0x86   :  { %v134_v42 = vpop.permute.xlu1 %133   ;;  %v113_v43 = vpop.permute.xlu0 %112  }
  0x87   :  { %189 = vst.msk [vmem:[%s291_s1 + $0x8] sm:$0xff] %vm104_vm2, %v113_v43  }
  0x88   :  { %190 = vst.msk [vmem:[%s291_s1 + $0x8] sm:$0xff] %vm125_vm3, %v134_v42  }
  0x8a   :  { %v155_v44 = vpop.permute.xlu1 %154   ;;  %v145_v45 = vpop.permute.xlu0 %144  }
  0x8b   :  { %191 = vst.msk [vmem:[%s291_s1 + $0x8] sm:$0xff] %vm146_vm4, %v155_v44   ;;  %147 = vst.msk [vmem:[%s291_s1] sm:$0xff] %vm146_vm4, %v145_v45  }

// kernel: _lambda_.1
= control target key start
LH: loop header
LB: loop body
LE: loop exit
PB: predicated region body
PF: predicated region fallthrough
CT: control target
= control target key end

     0   :  { %s3670_s0 = inlined_call_operand.vmem [shape: f32[32,64], index: 0, kind: input, shape index: {}]   ;;  %s3671_s1 = inlined_call_operand.vmem [shape: f32[1,64], index: 1, kind: input, shape index: {}, may-alias: {1,4,7,10,16}]   ;;  %s3672_s2 = inlined_call_operand.vmem [shape: bf16[64,384], index: 2, kind: input, shape index: {}]   ;;  %s3673_s3 = inlined_call_operand.vmem [shape: bf16[64,64], index: 3, kind: input, shape index: {}]   ;;  %s3674_s4 = inlined_call_operand.vmem [shape: f32[1,64], index: 4, kind: input, shape index: {}, may-alias: {1,4,7,10,16}]   ;;  %s3675_s5 = inlined_call_operand.vmem [shape: bf16[64,256], index: 5, kind: input, shape index: {}]   ;;  %s3676_s6 = inlined_call_operand.vmem [shape: bf16[128,64], index: 6, kind: input, shape index: {}]   ;;  %s3677_s7 = inlined_call_operand.vmem [shape: f32[1,64], index: 7, kind: input, shape index: {}, may-alias: {1,4,7,10,16}]   ;;  %s3678_s8 = inlined_call_operand.vmem [shape: bf16[64,384], index: 8, kind: input, shape index: {}]   ;;  %s3679_s9 = inlined_call_operand.vmem [shape: bf16[64,64], index: 9, kind: input, shape index: {}]   ;;  %s3680_s10 = inlined_call_operand.vmem [shape: f32[1,64], index: 10, kind: input, shape index: {}, may-alias: {1,4,7,10,16}]   ;;  %s3681_s11 = inlined_call_operand.vmem [shape: bf16[64,256], index: 11, kind: input, shape index: {}]   ;;  %s3682_s12 = inlined_call_operand.vmem [shape: bf16[128,64], index: 12, kind: input, shape index: {}]   ;;  %s3683_s13 = inlined_call_operand.vmem [shape: f32[16,128], index: 13, kind: input, shape index: {}]   ;;  %s3684_s14 = inlined_call_operand.vmem [shape: f32[16,128], index: 14, kind: input, shape index: {}]   ;;  %s3685_s15 = inlined_call_operand.vmem [shape: f32[16,16], index: 15, kind: input, shape index: {}]   ;;  %s3686_s16 = inlined_call_operand.vmem [shape: f32[1,64], index: 16, kind: input, shape index: {}, may-alias: {1,4,7,10,16}]   ;;  %s3687_s17 = inlined_call_operand.vmem [shape: bf16[64,256], index: 17, kind: input, shape index: {}]   ;;  %s3688_s18 = inlined_call_operand.vmem [shape: s32[32,1], index: 18, kind: input, shape index: {}]   ;;  %s3689_s19 = inlined_call_operand.vmem [shape: f32[32,1], index: 19, kind: output, shape index: {}]  }
   0x1   :  { %3695 = sst [smem:[#allocation2_spill]] %s3670_s0  ;;  %s3156_s0 = smov 0  }
   0x2   :  { %3696 = sst [smem:[#allocation3_spill]] %s3671_s1 }
   0x3   :  { %3697 = sst [smem:[#allocation4_spill]] %s3672_s2 }
   0x4   :  { %3698 = sst [smem:[#allocation5_spill]] %s3673_s3 }
   0x5 LB: > { %s2539_s30 = sadd.s32 4294967295, %s3048_s0   ;;  %p2543_p0 = scmp.ge.s32.totalorder %s3048_s0, 1  ;;  %s3048_s0 = sphi %s3156_s0, %s29_s0  }
   0x6   : > { %p549_p1 = scmp.lt.s32.totalorder %s3048_s0, 3 }
   0x8   : > { %p550_p2 = pnand %p2543_p0, %p549_p1 }
   0x9   : > { %s2544_s20 = sshll.u32 (!%p550_p2), %s2539_s30, 1  ;;  %s3699_s2 = sld [smem:[#allocation2_spill]] (!%p550_p2) }
   0xa   : > { %553 = sbr.rel (%p550_p2) target bundleno = 4738 (0x1282), region = 96  ;;  %p611_p3 = scmp.lt.s32.totalorder (!%p550_p2), %s2544_s20, 3 }
   0xb   : > { %s3700_s3 = sld [smem:[#allocation4_spill]] (!%p550_p2)  ;;  %s3694_s24 = smov (!%p550_p2), 64  }
   0xc   : > { %s3701_s26 = sld [smem:[#allocation3_spill]] (!%p550_p2)  ;;  %s3055_s25 = smov (!%p550_p2), 32  }
   0xd   : > { %s3702_s1 = sld [smem:[#allocation5_spill]] (!%p550_p2)  ;;  %s3703_s30 = smov (!%p550_p2), 64  }
   0xf   : > { %s3706_s20 = smov (!%p611_p3, %s2544_s20), 3  ;;  %vm639_vm0 = vcmask 523264   ;;  %v3050_v8 = vmov 0.0   ;;  %v3051_v11 = vmov 0   ;;  %vm3052_vm1 = vmmov 0   ;;  %v3241_v36 = vld [vmem:[%s3684_s14] sm:$0xff] }
  0x10   : > { %s3164_s21 = sshll.u32 %s3706_s20, 3  ;;  %2710 = vmatprep.subr.bf16.mxu1 %v3050_v8  ;;  %780 = vmatprep.mubr.bf16.mxu0 %v3051_v11  ;;  %v3246_v39 = vld [vmem:[%s3683_s13] sm:$0xff]  ;;  %v3251_v40 = vld [vmem:[%s3683_s13 + $0x8] sm:$0xff]  ;;  %vm843_vm2 = vcmask 261120   ;;  %vm895_vm3 = vcmask 130048   ;;  %s3704_s20 = smov 96  }
  0x11   : > { %s614_s23 = scalar_lea.vmem %s3699_s2, %s3164_s21  ;;  %v2870_v6 = vld [vmem:[%s3700_s3 + $0x4c] ss:$12 sps:$4 sm:$0xff]   ;;  %v2872_v7 = vld [vmem:[%s3700_s3 + $0x48] ss:$12 sps:$4 sm:$0xff]   ;;  %v2873_v9 = vld [vmem:[%s3700_s3 + $0x50] ss:$12 sps:$4 sm:$0xff]   ;;  %2869 = vset.pattern.permute.xlu1 %v3051_v11  ;;  %2718 = vmatprep.mubr.msk.bf16.mxu1 %vm3052_vm1, %v3050_v8  ;;  %s620_s28 = scalar_lea.vmem %s3688_s18, %s3164_s21 }
  0x12   : > { %v3170_v0 = vld [vmem:[%s614_s23] sm:$0xff]  ;;  %v3172_v1 = vld [vmem:[%s614_s23 + $0x8] sm:$0xff]  ;;  %756 = vmatprep.subr.bf16.mxu0 %v2870_v6  ;;  %2711 = vmatpush3.bf16.msra.mxu1 %v2873_v9  ;;  %v2876_v12 = vld [vmem:[%s3700_s3 + $0x30] ss:$12 sps:$4 sm:$0xff]   ;;  %s3692_s23 = smov 96  }
  0x13   : > { %v637_v2 = vmul.f32 %v3170_v0, %v3170_v0  ;;  %v638_v3 = vmul.f32 %v3172_v1, %v3172_v1  ;;  %v2874_v10 = vld [vmem:[%s3700_s3 + $0x34] ss:$12 sps:$4 sm:$0xff]   ;;  %757 = vmatpush1.bf16.msra.mxu0 %v2872_v7  ;;  %v2877_v13 = vld [vmem:[%s3700_s3 + $0x38] ss:$12 sps:$4 sm:$0xff]   ;;  %2712 = vmatprep.subr.bf16.mxu1 %v3050_v8  ;;  %v2878_v14 = vld [vmem:[%s3700_s3 + $0x1c] ss:$12 sps:$4 sm:$0xff]  }
  0x14   : > { %758 = vmatprep.subr.bf16.mxu0 %v2874_v10  ;;  %v2880_v15 = vld [vmem:[%s3700_s3 + $0x18] ss:$12 sps:$4 sm:$0xff]   ;;  %v2881_v16 = vld [vmem:[%s3700_s3 + $0x20] ss:$12 sps:$4 sm:$0xff]   ;;  %2868 = vset.pattern.permute.xlu0 %v3051_v11  ;;  %v2885_v19 = vld [vmem:[%s3700_s3 + $0x8] ss:$12 sps:$4 sm:$0xff]  }
  0x15   : > { %v640_v4 = vsel %vm639_vm0, %v637_v2, 0.0  ;;  %v643_v5 = vsel %vm639_vm0, %v638_v3, 0.0  ;;  %v2882_v17 = vld [vmem:[%s3700_s3 + $0x4] ss:$12 sps:$4 sm:$0xff]   ;;  %v2884_v18 = vld [vmem:[%s3700_s3] ss:$12 sps:$4 sm:$0xff]  }
  0x16   : > { %641 = vadd.xlane.f32.xlu0 %v640_v4  ;;  %2713 = vmatpush3.bf16.msra.mxu1 %v2877_v13  ;;  %v2550_v29 = vld [vmem:[%s3701_s26] ss:$0 sm:$0xff]  ;;  %v3256_v43 = vld [vmem:[%s3684_s14 + $0x8] sm:$0xff] }
  0x17   : > { %759 = vmatpush1.bf16.msra.mxu0 %v2876_v12  ;;  %2714 = vmatprep.subr.bf16.mxu1 %v3050_v8  ;;  %v3282_v60 = vld [vmem:[%s3685_s15] sm:$0xff]  ;;  %v3288_v3 = vld [vmem:[%s3685_s15 + $0x8] sm:$0xff] }
  0x18   : > { %760 = vmatprep.subr.bf16.mxu0 %v2878_v14 }
  0x1a   : > { %644 = vadd.xlane.f32.xlu0 %v643_v5  ;;  %2715 = vmatpush3.bf16.msra.mxu1 %v2881_v16 }
  0x1b   : > { %761 = vmatpush1.bf16.msra.mxu0 %v2880_v15  ;;  %2716 = vmatprep.subr.bf16.mxu1 %v3050_v8 }
  0x1c   : > { %762 = vmatprep.subr.bf16.mxu0 %v2882_v17 }
  0x1e   : > { %2717 = vmatpush3.bf16.msra.mxu1 %v2885_v19 }
  0x1f   : > { %763 = vmatpush1.bf16.msra.mxu0 %v2884_v18  ;;  %2728 = vmatprep.subr.bf16.mxu1 %v3050_v8 }
  0x20   : > { %2722 = vmatprep.subr.bf16.mxu0 %v3050_v8 }
  0x9f   : > { %v642_v20 = vpop.xlane.xlu0 %641 }
  0xa0   : > { %v647_v21 = vmul.f32 0.015625, %v642_v20 }
  0xa2   : > { %v649_v22 = vadd.f32 1e-06, %v647_v21 }
  0xa3   : > { %v645_v23 = vpop.xlane.xlu0 %644 }
  0xa4   : > { %2962 = vrsqrt.f32 %v649_v22  ;;  %v648_v24 = vmul.f32 0.015625, %v645_v23 }
  0xa6   : > { %v650_v25 = vadd.f32 1e-06, %v648_v24 }
  0xa8   : > { %2964 = vrsqrt.f32 %v650_v25 }
  0xb1   : > { %v2963_v26 = vpop.eup %2962 }
  0xb2   : > { %v653_v27 = vmul.f32 %v2963_v26, %v3170_v0 }
  0xb4   : > { %v662_v31 = vmul.f32 %v2550_v29, %v653_v27 }
  0xb5   : > { %v2965_v28 = vpop.eup %2964 }
  0xb6   : > { %v654_v30 = vmul.f32 %v2965_v28, %v3172_v1 }
  0xb8   : > { %v663_v32 = vmul.f32 %v2550_v29, %v654_v30 }
  0xba   : > { %v664_v33 = vpack.c.bf16 %v663_v32, %v662_v31 }
  0xbc   : > { %2563 = vmatmul.mubr.msk.bf16.vlgmr.msra.gmra.mxu0 %vm639_vm0, %v664_v33  ;;  %2719 = vmatmul.mubr.msk.bf16.vlgmr.msra.gmra.mxu1 %vm639_vm0, %v664_v33 }
  0xbd   : > { %2724 = vmatprep.mubr.msk.bf16.mxu0 %vm3052_vm1, %v3050_v8  ;;  %2730 = vmatprep.mubr.msk.bf16.mxu1 %vm3052_vm1, %v3050_v8 }
 0x17c   : > { %v782_v34 = vpop.f32.mrf.mxu0  ;;  %v825_v35 = vpop.f32.mrf.mxu1 }
 0x17d   : > { %v832_v48 = vmul.f32 %v782_v34, %v3246_v39 }
 0x17e   : > { %v784_v37 = vpop.f32.mrf.mxu0  ;;  %v2720_v38 = vpop.f32.mrf.mxu1 }
 0x17f   : > { %v834_v44 = vmul.f32 %v784_v37, %v3241_v36 }
 0x180   : > { %v786_v41 = vpop.f32.mrf.mxu0  ;;  %v828_v42 = vpop.f32.mrf.mxu1 }
 0x181   : > { %v3259_v45 = vpack.c.bf16 %v828_v42, %v825_v35  ;;  %v833_v49 = vmul.f32 %v786_v41, %v3251_v40  ;;  %v836_v51 = vadd.f32 %v834_v44, %v832_v48 }
 0x182   : > { %v788_v46 = vpop.f32.mrf.mxu0  ;;  %v2721_v47 = vpop.f32.mrf.mxu1 }
 0x183   : > { %v835_v50 = vmul.f32 %v788_v46, %v3256_v43  ;;  %2729 = vmatpush3.bf16.msra.mxu1 %v3259_v45 }
 0x184   : > { %2740 = vmatprep.subr.bf16.mxu1 %v3050_v8 }
 0x185   : > { %v837_v52 = vadd.f32 %v835_v50, %v833_v49 }
 0x187   : > { %v838_v53 = vpack.c.bf16 %v837_v52, %v836_v51 }
 0x189   : > { %968 = vrot.lane.b32.xlu0 %v838_v53, %s3692_s23  ;;  %841 = vrot.lane.b32.xlu1 %v838_v53, %s3694_s24 }
 0x18d   : > { %970 = vrot.lane.b32.xlu1 %v838_v53, %s3055_s25 }
 0x1fb   : > { %v842_v54 = vpop.permute.xlu1 %841  ;;  %v969_v58 = vpop.permute.xlu0 %968 }
 0x1fc   : > { %v848_v55 = vsel %vm843_vm2, %v842_v54, 0 }
 0x1fd   : > { %2723 = vmatpush3.bf16.xpose.msra.mxu0 %v848_v55 }
 0x1fe   : > { %2734 = vmatprep.subr.bf16.mxu0 %v3050_v8 }
 0x1ff   : > { %v971_v56 = vpop.permute.xlu1 %970 }
 0x200   : > { %v976_v57 = vsel %vm843_vm2, %v971_v56, 0 }
 0x204   : > { %2725 = vmatmul.mubr.msk.bf16.vlgmr.msra.gmra.mxu0 %vm843_vm2, %v838_v53 }
 0x205   : > { %2735 = vmatpush3.bf16.xpose.msra.mxu0 %v976_v57  ;;  %2736 = vmatprep.mubr.msk.bf16.mxu0 %vm3052_vm1, %v3050_v8 }
 0x206   : > { %2746 = vmatprep.subr.bf16.mxu0 %v3050_v8 }
 0x20c   : > { %2737 = vmatmul.mubr.msk.bf16.vlgmr.msra.gmra.mxu0 %vm843_vm2, %v969_v58 }
 0x20d   : > { %2750 = vmatprep.mubr.msk.bf16.mxu0 %vm3052_vm1, %v3050_v8 }
 0x2c4   : > { %v884_v59 = vpop.f32.mrf.mxu0 }
 0x2c5   : > { %v891_v61 = vmul.f32 0.17677669, %v884_v59 }
 0x2c6   : > { %v2726_v62 = vpop.f32.mrf.mxu0 }
 0x2c7   : > { %v893_v63 = vadd.f32 %v891_v61, %v3282_v60  ;;  %v2886_v61 = vld [vmem:[%s3702_s1 + $0x8] sm:$0xff]   ;;  %v2887_v62 = vld [vmem:[%s3702_s1] sm:$0xff]  }
 0x2c8   : > { %v887_v2 = vpop.f32.mrf.mxu0 }
 0x2c9   : > { %v892_v4 = vmul.f32 0.17677669, %v887_v2  ;;  %v896_v5 = vsel %vm895_vm3, %v893_v63, -inf  ;;  %v2889_v2 = vld [vmem:[%s3702_s1 + $0x10] sm:$0xff]  }
 0x2ca   : > { %897 = vmax.xlane.f32.xlu1 %v896_v5  ;;  %v2727_v6 = vpop.f32.mrf.mxu0 }
 0x2cb   : > { %v894_v7 = vadd.f32 %v892_v4, %v3288_v3 }
 0x2cc   : > { %v1012_v9 = vpop.f32.mrf.mxu0 }
 0x2cd   : > { %v1019_v10 = vmul.f32 0.17677669, %v1012_v9  ;;  %v899_v12 = vsel %vm895_vm3, %v894_v7, -inf }
 0x2ce   : > { %900 = vmax.xlane.f32.xlu0 %v899_v12  ;;  %v2738_v13 = vpop.f32.mrf.mxu0 }
 0x2cf   : > { %v1021_v14 = vadd.f32 %v1019_v10, %v3282_v60 }
 0x2d0   : > { %v1015_v15 = vpop.f32.mrf.mxu0 }
 0x2d1   : > { %v1020_v16 = vmul.f32 0.17677669, %v1015_v15  ;;  %v1023_v17 = vsel %vm895_vm3, %v1021_v14, -inf }
 0x2d2   : > { %1024 = vmax.xlane.f32.xlu1 %v1023_v17  ;;  %v2739_v18 = vpop.f32.mrf.mxu0 }
 0x2d3   : > { %v1022_v19 = vadd.f32 %v1020_v16, %v3288_v3 }
 0x2d5   : > { %v1026_v20 = vsel %vm895_vm3, %v1022_v19, -inf }
 0x2d6   : > { %1027 = vmax.xlane.f32.xlu1 %v1026_v20 }
 0x353   : > { %v898_v21 = vpop.xlane.xlu1 %897 }
 0x354   : > { %v902_v22 = vsub.f32 %v893_v63, %v898_v21  ;;  %v2888_v63 = vld [vmem:[%s3702_s1 + $0x18] sm:$0xff]  }
 0x355   : > { %2747 = vmatpush3.bf16.msra.mxu0 %v2888_v63  ;;  %v2908_v63 = vld [vmem:[%s3676_s6 + $0x8] sm:$0xff]  }
 0x356   : > { %v904_v23 = vmul.f32 1.442695, %v902_v22  ;;  %2748 = vmatprep.subr.bf16.mxu0 %v3050_v8 }
 0x357   : > { %v901_v24 = vpop.xlane.xlu0 %900 }
 0x358   : > { %2966 = vpow2.f32 %v904_v23  ;;  %v903_v25 = vsub.f32 %v894_v7, %v901_v24 }
 0x359   : > { %2749 = vmatpush3.bf16.msra.mxu0 %v2889_v2  ;;  %v2909_v2 = vld [vmem:[%s3676_s6] sm:$0xff]  }
 0x35a   : > { %v906_v26 = vmul.f32 1.442695, %v903_v25 }
 0x35b   : > { %v1025_v27 = vpop.xlane.xlu1 %1024 }
 0x35c   : > { %2968 = vpow2.f32 %v906_v26  ;;  %v1029_v28 = vsub.f32 %v1021_v14, %v1025_v27 }
 0x35e   : > { %v1031_v29 = vmul.f32 1.442695, %v1029_v28 }
 0x35f   : > { %v1028_v30 = vpop.xlane.xlu1 %1027 }
 0x360   : > { %2970 = vpow2.f32 %v1031_v29  ;;  %v1030_v31 = vsub.f32 %v1022_v19, %v1028_v30 }
 0x362   : > { %v1033_v32 = vmul.f32 1.442695, %v1030_v31 }
 0x364   : > { %2972 = vpow2.f32 %v1033_v32  ;;  %v2890_v32 = vld [vmem:[%s3675_s5 + $0x30] ss:$8 sps:$4 sm:$0xff]  }
 0x365   : > { %v2967_v33 = vpop.eup %2966 }
 0x366   : > { %v908_v34 = vsel %vm895_vm3, %v2967_v33, 0.0 }
 0x367   : > { %909 = vadd.xlane.f32.xlu1 %v908_v34  ;;  %v2898_v34 = vld [vmem:[%s3675_s5 + $0x14] ss:$8 sps:$4 sm:$0xff]  }
 0x369   : > { %v2969_v35 = vpop.eup %2968 }
 0x36a   : > { %v911_v37 = vsel %vm895_vm3, %v2969_v35, 0.0 }
 0x36b   : > { %912 = vadd.xlane.f32.xlu1 %v911_v37  ;;  %v2899_v37 = vld [vmem:[%s3675_s5] ss:$8 sps:$4 sm:$0xff]  }
 0x36d   : > { %v2971_v38 = vpop.eup %2970 }
 0x36e   : > { %v1035_v41 = vsel %vm895_vm3, %v2971_v38, 0.0 }
 0x36f   : > { %1036 = vadd.xlane.f32.xlu1 %v1035_v41 }
 0x371   : > { %v2973_v42 = vpop.eup %2972 }
 0x372   : > { %v1038_v44 = vsel %vm895_vm3, %v2973_v42, 0.0 }
 0x373   : > { %1039 = vadd.xlane.f32.xlu0 %v1038_v44 }
 0x380   : > { %1047 = vrot.lane.b32.xlu1 %v3259_v45, %s3692_s23 }
 0x3f0   : > { %v910_v46 = vpop.xlane.xlu1 %909 }
 0x3f1   : > { %2974 = vrcp.f32 %v910_v46 }
 0x3f4   : > { %v913_v47 = vpop.xlane.xlu1 %912 }
 0x3f5   : > { %2976 = vrcp.f32 %v913_v47 }
 0x3f8   : > { %v1037_v48 = vpop.xlane.xlu1 %1036 }
 0x3f9   : > { %2978 = vrcp.f32 %v1037_v48 }
 0x3fc   : > { %v1040_v49 = vpop.xlane.xlu0 %1039  ;;  %v1048_v55 = vpop.permute.xlu1 %1047 }
 0x3fd   : > { %2980 = vrcp.f32 %v1040_v49 }
 0x3fe   : > { %v2975_v50 = vpop.eup %2974 }
 0x3ff   : > { %v916_v52 = vmul.f32 %v2975_v50, %v2967_v33  ;;  %v2893_v33 = vld [vmem:[%s3675_s5 + $0x20] ss:$8 sps:$4 sm:$0xff]  }
 0x402   : > { %v2977_v51 = vpop.eup %2976 }
 0x403   : > { %v917_v53 = vmul.f32 %v2977_v51, %v2969_v35  ;;  %v2896_v35 = vld [vmem:[%s3675_s5 + $0x10] ss:$8 sps:$4 sm:$0xff]  }
 0x405   : > { %v918_v54 = vpack.c.bf16 %v917_v53, %v916_v52  ;;  %v2575_v52 = vld [vmem:[%s3674_s4] ss:$0 sm:$0xff] }
 0x406   : > { %v2979_v56 = vpop.eup %2978 }
 0x407   : > { %2731 = vmatmul.mubr.msk.bf16.vlgmr.msra.gmra.mxu1 %vm895_vm3, %v918_v54  ;;  %v1043_v57 = vmul.f32 %v2979_v56, %v2971_v38  ;;  %v2901_v38 = vld [vmem:[%s3675_s5 + $0x4] ss:$8 sps:$4 sm:$0xff]  }
 0x408   : > { %2741 = vmatpush3.bf16.msra.mxu1 %v1048_v55  ;;  %2742 = vmatprep.mubr.msk.bf16.mxu1 %vm3052_vm1, %v3050_v8 }
 0x409   : > { %2754 = vmatprep.subr.bf16.mxu1 %v3050_v8 }
 0x40a   : > { %v2981_v45 = vpop.eup %2980 }
 0x40b   : > { %v1044_v58 = vmul.f32 %v2981_v45, %v2973_v42  ;;  %v2902_v45 = vld [vmem:[%s3676_s6 + $0x38] sm:$0xff]  }
 0x40d   : > { %v1045_v59 = vpack.c.bf16 %v1044_v58, %v1043_v57  ;;  %v2903_v57 = vld [vmem:[%s3676_s6 + $0x30] sm:$0xff]   ;;  %v2904_v58 = vld [vmem:[%s3676_s6 + $0x28] sm:$0xff]  }
 0x40f   : > { %2743 = vmatmul.mubr.msk.bf16.vlgmr.msra.gmra.mxu1 %vm895_vm3, %v1045_v59  ;;  %v2905_v59 = vld [vmem:[%s3676_s6 + $0x20] sm:$0xff]  }
 0x410   : > { %2758 = vmatprep.mubr.msk.bf16.mxu1 %vm3052_vm1, %v3050_v8  ;;  %2755 = vmatpush3.bf16.msra.mxu1 %v2886_v61  ;;  %v2906_v61 = vld [vmem:[%s3676_s6 + $0x18] sm:$0xff]  }
 0x411   : > { %2756 = vmatprep.subr.bf16.mxu1 %v3050_v8 }
 0x414   : > { %2757 = vmatpush3.bf16.msra.mxu1 %v2887_v62  ;;  %v2907_v62 = vld [vmem:[%s3676_s6 + $0x10] sm:$0xff]  }
 0x415   : > { %2762 = vmatprep.subr.bf16.mxu1 %v3050_v8 }
 0x4c7   : > { %v956_v4 = vpop.f32.mrf.mxu1 }
 0x4c9   : > { %v2732_v5 = vpop.f32.mrf.mxu1 }
 0x4cb   : > { %v959_v6 = vpop.f32.mrf.mxu1 }
 0x4cc   : > { %v967_v7 = vpack.c.bf16 %v959_v6, %v956_v4 }
 0x4cd   : > { %v2733_v9 = vpop.f32.mrf.mxu1 }
 0x4ce   : > { %2759 = vmatmul.mubr.msk.bf16.vlgmr.msra.gmra.mxu1 %vm843_vm2, %v967_v7 }
 0x4cf   : > { %v1087_v10 = vpop.f32.mrf.mxu1  ;;  %2778 = vmatprep.mubr.msk.bf16.mxu1 %vm3052_vm1, %v3050_v8  ;;  %2763 = vmatpush3.bf16.msra.mxu1 %v2902_v45  ;;  %v2922_v45 = vld [vmem:[%s3678_s8 + $0x50] ss:$12 sps:$4 sm:$0xff]  }
 0x4d0   : > { %2764 = vmatprep.subr.bf16.mxu1 %v3050_v8 }
 0x4d1   : > { %v2744_v12 = vpop.f32.mrf.mxu1 }
 0x4d3   : > { %v1090_v13 = vpop.f32.mrf.mxu1  ;;  %2765 = vmatpush3.bf16.msra.mxu1 %v2903_v57 }
 0x4d4   : > { %v1098_v14 = vpack.c.bf16 %v1090_v13, %v1087_v10  ;;  %2766 = vmatprep.subr.bf16.mxu1 %v3050_v8 }
 0x4d5   : > { %v2745_v15 = vpop.f32.mrf.mxu1 }
 0x4d6   : > { %2751 = vmatmul.mubr.msk.bf16.vlgmr.msra.gmra.mxu0 %vm843_vm2, %v1098_v14 }
 0x4d7   : > { %1322 = vmatprep.mubr.bf16.mxu0 %v3051_v11  ;;  %2767 = vmatpush3.bf16.msra.mxu1 %v2904_v58  ;;  %v2923_v58 = vld [vmem:[%s3678_s8 + $0x38] ss:$12 sps:$4 sm:$0xff]  }
 0x4d8   : > { %2768 = vmatprep.subr.bf16.mxu1 %v3050_v8 }
 0x4db   : > { %2769 = vmatpush3.bf16.msra.mxu1 %v2905_v59  ;;  %v2924_v59 = vld [vmem:[%s3678_s8 + $0x20] ss:$12 sps:$4 sm:$0xff]  }
 0x4dc   : > { %2770 = vmatprep.subr.bf16.mxu1 %v3050_v8 }
 0x4df   : > { %2771 = vmatpush3.bf16.msra.mxu1 %v2906_v61  ;;  %v2925_v61 = vld [vmem:[%s3678_s8 + $0x8] ss:$12 sps:$4 sm:$0xff]  }
 0x4e0   : > { %2772 = vmatprep.subr.bf16.mxu1 %v3050_v8 }
 0x4e3   : > { %2773 = vmatpush3.bf16.msra.mxu1 %v2907_v62 }
 0x4e4   : > { %2774 = vmatprep.subr.bf16.mxu1 %v3050_v8 }
 0x4e7   : > { %2775 = vmatpush3.bf16.msra.mxu1 %v2908_v63 }
 0x4e8   : > { %2776 = vmatprep.subr.bf16.mxu1 %v3050_v8 }
 0x4eb   : > { %2777 = vmatpush3.bf16.msra.mxu1 %v2909_v2 }
 0x4ec   : > { %2794 = vmatprep.subr.bf16.mxu1 %v3050_v8 }
 0x58e   : > { %v1204_v16 = vpop.f32.mrf.mxu1 }
 0x590   : > { %v2760_v17 = vpop.f32.mrf.mxu1 }
 0x592   : > { %v1207_v18 = vpop.f32.mrf.mxu1 }
 0x594   : > { %v2761_v19 = vpop.f32.mrf.mxu1 }
 0x596   : > { %v1148_v20 = vpop.f32.mrf.mxu0 }
 0x597   : > { %v1205_v21 = vadd.f32 %v1204_v16, %v1148_v20 }
 0x598   : > { %v2752_v22 = vpop.f32.mrf.mxu0 }
 0x599   : > { %v3331_v23 = vadd.f32 %v1205_v21, %v3170_v0  ;;  %v2892_v0 = vld [vmem:[%s3675_s5 + $0x34] ss:$8 sps:$4 sm:$0xff]  }
 0x59a   : > { %v1151_v24 = vpop.f32.mrf.mxu0  ;;  %1298 = vmatprep.subr.bf16.mxu0 %v2892_v0 }
 0x59b   : > { %v1208_v25 = vadd.f32 %v1207_v18, %v1151_v24  ;;  %v1213_v26 = vmul.f32 %v3331_v23, %v3331_v23  ;;  %1299 = vmatpush1.bf16.msra.mxu0 %v2890_v32 }
 0x59c   : > { %v2753_v27 = vpop.f32.mrf.mxu0 }
 0x59d   : > { %v3336_v28 = vadd.f32 %v1208_v25, %v3172_v1  ;;  %v1215_v29 = vsel %vm639_vm0, %v1213_v26, 0.0  ;;  %v2895_v1 = vld [vmem:[%s3675_s5 + $0x24] ss:$8 sps:$4 sm:$0xff]  }
 0x59e   : > { %1216 = vadd.xlane.f32.xlu0 %v1215_v29  ;;  %1300 = vmatprep.subr.bf16.mxu0 %v2895_v1 }
 0x59f   : > { %v1214_v30 = vmul.f32 %v3336_v28, %v3336_v28  ;;  %1301 = vmatpush1.bf16.msra.mxu0 %v2893_v33  ;;  %v2910_v33 = vld [vmem:[%s3678_s8 + $0x48] ss:$12 sps:$4 sm:$0xff]  }
 0x5a0   : > { %1302 = vmatprep.subr.bf16.mxu0 %v2898_v34  ;;  %v2913_v34 = vld [vmem:[%s3678_s8 + $0x30] ss:$12 sps:$4 sm:$0xff]  }
 0x5a1   : > { %v1218_v31 = vsel %vm639_vm0, %v1214_v30, 0.0 }
 0x5a2   : > { %1219 = vadd.xlane.f32.xlu0 %v1218_v31 }
 0x5a3   : > { %1303 = vmatpush1.bf16.msra.mxu0 %v2896_v35  ;;  %v2918_v35 = vld [vmem:[%s3678_s8 + $0x1c] ss:$12 sps:$4 sm:$0xff]  }
 0x5a4   : > { %1304 = vmatprep.subr.bf16.mxu0 %v2901_v38  ;;  %v2919_v38 = vld [vmem:[%s3678_s8] ss:$12 sps:$4 sm:$0xff]  }
 0x5a7   : > { %1305 = vmatpush1.bf16.msra.mxu0 %v2899_v37  ;;  %v2916_v37 = vld [vmem:[%s3678_s8 + $0x18] ss:$12 sps:$4 sm:$0xff]  }
 0x627   : > { %v1217_v41 = vpop.xlane.xlu0 %1216 }
 0x628   : > { %v1221_v42 = vmul.f32 0.015625, %v1217_v41  ;;  %v2921_v41 = vld [vmem:[%s3678_s8 + $0x4] ss:$12 sps:$4 sm:$0xff]  }
 0x62a   : > { %v1223_v44 = vadd.f32 1e-06, %v1221_v42 }
 0x62b   : > { %v1220_v46 = vpop.xlane.xlu0 %1219 }
 0x62c   : > { %2982 = vrsqrt.f32 %v1223_v44  ;;  %v1222_v47 = vmul.f32 0.015625, %v1220_v46 }
 0x62e   : > { %v1224_v48 = vadd.f32 1e-06, %v1222_v47 }
 0x630   : > { %2984 = vrsqrt.f32 %v1224_v48 }
 0x639   : > { %v2983_v49 = vpop.eup %2982 }
 0x63a   : > { %v1227_v50 = vmul.f32 %v2983_v49, %v3331_v23 }
 0x63c   : > { %v1236_v54 = vmul.f32 %v2575_v52, %v1227_v50 }
 0x63d   : > { %v2985_v51 = vpop.eup %2984 }
 0x63e   : > { %v1228_v53 = vmul.f32 %v2985_v51, %v3336_v28 }
 0x640   : > { %v1237_v55 = vmul.f32 %v2575_v52, %v1228_v53  ;;  %v2595_v53 = vld [vmem:[%s3677_s7] ss:$0 sm:$0xff] }
 0x642   : > { %v1238_v56 = vpack.c.bf16 %v1237_v55, %v1236_v54 }
 0x644   : > { %2584 = vmatmul.mubr.msk.bf16.vlgmr.msra.gmra.mxu0 %vm639_vm0, %v1238_v56 }
 0x645   : > { %1598 = vmatprep.mubr.bf16.mxu0 %v3051_v11 }
 0x704   : > { %v1324_v4 = vpop.f32.mrf.mxu0 }
 0x705   : > { %v2585_v5 = vmul.f32 -1.442695, %v1324_v4 }
 0x706   : > { %v1326_v6 = vpop.f32.mrf.mxu0 }
 0x707   : > { %2986 = vpow2.f32 %v2585_v5 }
 0x708   : > { %v1328_v7 = vpop.f32.mrf.mxu0 }
 0x709   : > { %v2586_v9 = vmul.f32 -1.442695, %v1328_v7 }
 0x70a   : > { %v1330_v19 = vpop.f32.mrf.mxu0 }
 0x70b   : > { %2988 = vpow2.f32 %v2586_v9 }
 0x714   : > { %v2987_v10 = vpop.eup %2986 }
 0x715   : > { %v1339_v12 = vadd.f32 1.0, %v2987_v10 }
 0x717   : > { %2990 = vrcp.f32 %v1339_v12 }
 0x718   : > { %v2989_v13 = vpop.eup %2988 }
 0x719   : > { %v1340_v14 = vadd.f32 1.0, %v2989_v13 }
 0x71b   : > { %2992 = vrcp.f32 %v1340_v14 }
 0x724   : > { %v2991_v15 = vpop.eup %2990 }
 0x725   : > { %v1345_v16 = vmul.f32 %v2991_v15, %v1324_v4 }
 0x727   : > { %v1347_v20 = vmul.f32 %v1345_v16, %v1326_v6 }
 0x728   : > { %v2993_v17 = vpop.eup %2992 }
 0x729   : > { %v1346_v18 = vmul.f32 %v2993_v17, %v1328_v7 }
 0x72b   : > { %v1348_v21 = vmul.f32 %v1346_v18, %v1330_v19 }
 0x72d   : > { %v1349_v22 = vpack.c.bf16 %v1348_v21, %v1347_v20 }
 0x72f   : > { %2779 = vmatmul.mubr.bf16.vlgmr.msra.gmra.mxu1 %v1349_v22 }
 0x730   : > { %2796 = vmatprep.mubr.msk.bf16.mxu1 %vm3052_vm1, %v3050_v8 }
 0x7ef   : > { %v1448_v24 = vpop.f32.mrf.mxu1 }
 0x7f0   : > { %v3408_v25 = vadd.f32 %v1448_v24, %v3331_v23  ;;  %v2912_v23 = vld [vmem:[%s3678_s8 + $0x4c] ss:$12 sps:$4 sm:$0xff]  }
 0x7f1   : > { %v2780_v26 = vpop.f32.mrf.mxu1  ;;  %1574 = vmatprep.subr.bf16.mxu0 %v2912_v23 }
 0x7f2   : > { %v1457_v27 = vmul.f32 %v3408_v25, %v3408_v25  ;;  %1575 = vmatpush1.bf16.msra.mxu0 %v2910_v33 }
 0x7f3   : > { %v1451_v29 = vpop.f32.mrf.mxu1 }
 0x7f4   : > { %v3413_v30 = vadd.f32 %v1451_v29, %v3336_v28  ;;  %v1459_v31 = vsel %vm639_vm0, %v1457_v27, 0.0  ;;  %v2915_v28 = vld [vmem:[%s3678_s8 + $0x34] ss:$12 sps:$4 sm:$0xff]  }
 0x7f5   : > { %1460 = vadd.xlane.f32.xlu0 %v1459_v31  ;;  %v2781_v0 = vpop.f32.mrf.mxu1  ;;  %1576 = vmatprep.subr.bf16.mxu0 %v2915_v28 }
 0x7f6   : > { %v1458_v32 = vmul.f32 %v3413_v30, %v3413_v30  ;;  %1577 = vmatpush1.bf16.msra.mxu0 %v2913_v34 }
 0x7f7   : > { %1578 = vmatprep.subr.bf16.mxu0 %v2918_v35 }
 0x7f8   : > { %v1462_v1 = vsel %vm639_vm0, %v1458_v32, 0.0 }
 0x7f9   : > { %1463 = vadd.xlane.f32.xlu0 %v1462_v1 }
 0x7fa   : > { %1579 = vmatpush1.bf16.msra.mxu0 %v2916_v37 }
 0x7fb   : > { %1580 = vmatprep.subr.bf16.mxu0 %v2921_v41 }
 0x7fe   : > { %1581 = vmatpush1.bf16.msra.mxu0 %v2919_v38 }
 0x7ff   : > { %2782 = vmatprep.subr.bf16.mxu0 %v3050_v8 }
 0x87e   : > { %v1461_v42 = vpop.xlane.xlu0 %1460 }
 0x87f   : > { %v1465_v44 = vmul.f32 0.015625, %v1461_v42 }
 0x881   : > { %v1467_v46 = vadd.f32 1e-06, %v1465_v44 }
 0x882   : > { %v1464_v47 = vpop.xlane.xlu0 %1463 }
 0x883   : > { %2994 = vrsqrt.f32 %v1467_v46  ;;  %v1466_v48 = vmul.f32 0.015625, %v1464_v47 }
 0x885   : > { %v1468_v49 = vadd.f32 1e-06, %v1466_v48 }
 0x887   : > { %2996 = vrsqrt.f32 %v1468_v49 }
 0x890   : > { %v2995_v50 = vpop.eup %2994 }
 0x891   : > { %v1471_v51 = vmul.f32 %v2995_v50, %v3408_v25 }
 0x893   : > { %v1480_v55 = vmul.f32 %v2595_v53, %v1471_v51 }
 0x894   : > { %v2997_v52 = vpop.eup %2996 }
 0x895   : > { %v1472_v54 = vmul.f32 %v2997_v52, %v3413_v30 }
 0x897   : > { %v1481_v56 = vmul.f32 %v2595_v53, %v1472_v54 }
 0x899   : > { %v1482_v57 = vpack.c.bf16 %v1481_v56, %v1480_v55 }
 0x89b   : > { %2608 = vmatmul.mubr.msk.bf16.vlgmr.msra.gmra.mxu0 %vm639_vm0, %v1482_v57 }
 0x89c   : > { %2783 = vmatpush3.bf16.msra.mxu0 %v2922_v45  ;;  %2790 = vmatprep.mubr.msk.bf16.mxu0 %vm3052_vm1, %v3050_v8 }
 0x89d   : > { %2784 = vmatprep.subr.bf16.mxu0 %v3050_v8 }
 0x8a0   : > { %2785 = vmatpush3.bf16.msra.mxu0 %v2923_v58 }
 0x8a1   : > { %2786 = vmatprep.subr.bf16.mxu0 %v3050_v8 }
 0x8a4   : > { %2787 = vmatpush3.bf16.msra.mxu0 %v2924_v59 }
 0x8a5   : > { %2788 = vmatprep.subr.bf16.mxu0 %v3050_v8 }
 0x8a8   : > { %2789 = vmatpush3.bf16.msra.mxu0 %v2925_v61 }
 0x8a9   : > { %2806 = vmatprep.subr.bf16.mxu0 %v3050_v8 }
 0x8ab   : > { %2791 = vmatmul.mubr.msk.bf16.vlgmr.msra.gmra.mxu0 %vm639_vm0, %v1482_v57 }
 0x8ac   : > { %2808 = vmatprep.mubr.msk.bf16.mxu0 %vm3052_vm1, %v3050_v8 }
 0x95b   : > { %v1600_v62 = vpop.f32.mrf.mxu0 }
 0x95c   : > { %v1650_v6 = vmul.f32 %v1600_v62, %v3246_v39 }
 0x95d   : > { %v1602_v63 = vpop.f32.mrf.mxu0 }
 0x95e   : > { %v1652_v4 = vmul.f32 %v1602_v63, %v3241_v36 }
 0x95f   : > { %v1604_v2 = vpop.f32.mrf.mxu0 }
 0x960   : > { %v1651_v7 = vmul.f32 %v1604_v2, %v3251_v40  ;;  %v1654_v10 = vadd.f32 %v1652_v4, %v1650_v6 }
 0x961   : > { %v1606_v5 = vpop.f32.mrf.mxu0 }
 0x962   : > { %v1653_v9 = vmul.f32 %v1606_v5, %v3256_v43 }
 0x964   : > { %v1655_v12 = vadd.f32 %v1653_v9, %v1651_v7 }
 0x966   : > { %v1656_v13 = vpack.c.bf16 %v1655_v12, %v1654_v10 }
 0x968   : > { %1786 = vrot.lane.b32.xlu1 %v1656_v13, %s3055_s25  ;;  %1659 = vrot.lane.b32.xlu0 %v1656_v13, %s3703_s30 }
 0x96b   : > { %v1643_v14 = vpop.f32.mrf.mxu0 }
 0x96c   : > { %1784 = vrot.lane.b32.xlu1 %v1656_v13, %s3704_s20 }
 0x96d   : > { %v2792_v15 = vpop.f32.mrf.mxu0 }
 0x96f   : > { %v1646_v16 = vpop.f32.mrf.mxu0 }
 0x970   : > { %v3478_v36 = vpack.c.bf16 %v1646_v16, %v1643_v14 }
 0x971   : > { %v2793_v17 = vpop.f32.mrf.mxu0 }
 0x9da   : > { %v1787_v39 = vpop.permute.xlu1 %1786  ;;  %v1660_v18 = vpop.permute.xlu0 %1659 }
 0x9db   : > { %v1792_v40 = vsel %vm843_vm2, %v1787_v39, 0  ;;  %v1665_v43 = vsel %vm843_vm2, %v1660_v18, 0  ;;  %v2926_v39 = vld [vmem:[%s3679_s9 + $0x8] sm:$0xff]   ;;  %v2927_v18 = vld [vmem:[%s3679_s9] sm:$0xff]  }
 0x9dc   : > { %2795 = vmatpush3.bf16.xpose.msra.mxu1 %v1665_v43  ;;  %2807 = vmatpush3.bf16.xpose.msra.mxu0 %v1792_v40  ;;  %v2928_v40 = vld [vmem:[%s3679_s9 + $0x18] sm:$0xff]   ;;  %v2929_v43 = vld [vmem:[%s3679_s9 + $0x10] sm:$0xff]  }
 0x9dd   : > { %2800 = vmatprep.subr.bf16.mxu1 %v3050_v8  ;;  %2818 = vmatprep.subr.bf16.mxu0 %v3050_v8 }
 0x9de   : > { %v1785_v19 = vpop.permute.xlu1 %1784 }
 0x9e3   : > { %2797 = vmatmul.mubr.msk.bf16.vlgmr.msra.gmra.mxu1 %vm843_vm2, %v1656_v13  ;;  %2809 = vmatmul.mubr.msk.bf16.vlgmr.msra.gmra.mxu0 %vm843_vm2, %v1785_v19 }
 0x9e4   : > { %2801 = vmatpush3.bf16.msra.mxu1 %v3478_v36  ;;  %2802 = vmatprep.mubr.msk.bf16.mxu1 %vm3052_vm1, %v3050_v8 }
 0x9e5   : > { %2812 = vmatprep.subr.bf16.mxu1 %v3050_v8  ;;  %2822 = vmatprep.mubr.msk.bf16.mxu0 %vm3052_vm1, %v3050_v8 }
 0x9e6   : > { %2819 = vmatpush3.bf16.msra.mxu0 %v2928_v40 }
 0x9e7   : > { %2820 = vmatprep.subr.bf16.mxu0 %v3050_v8 }
 0x9ea   : > { %2821 = vmatpush3.bf16.msra.mxu0 %v2929_v43 }
 0xaa3   : > { %v1701_v20 = vpop.f32.mrf.mxu1  ;;  %v1828_v21 = vpop.f32.mrf.mxu0 }
 0xaa4   : > { %v1708_v22 = vmul.f32 0.17677669, %v1701_v20  ;;  %v1835_v24 = vmul.f32 0.17677669, %v1828_v21 }
 0xaa5   : > { %v2798_v26 = vpop.f32.mrf.mxu1  ;;  %v2810_v27 = vpop.f32.mrf.mxu0 }
 0xaa6   : > { %v1710_v29 = vadd.f32 %v1708_v22, %v3282_v60  ;;  %v1837_v33 = vadd.f32 %v1835_v24, %v3282_v60 }
 0xaa7   : > { %v1704_v31 = vpop.f32.mrf.mxu1  ;;  %v1831_v0 = vpop.f32.mrf.mxu0 }
 0xaa8   : > { %v1709_v32 = vmul.f32 0.17677669, %v1704_v31  ;;  %v1836_v1 = vmul.f32 0.17677669, %v1831_v0  ;;  %v1712_v23 = vsel %vm895_vm3, %v1710_v29, -inf  ;;  %v1839_v37 = vsel %vm895_vm3, %v1837_v33, -inf }
 0xaa9   : > { %v2811_v28 = vpop.f32.mrf.mxu0  ;;  %1713 = vmax.xlane.f32.xlu1 %v1712_v23  ;;  %v2799_v34 = vpop.f32.mrf.mxu1 }
 0xaaa   : > { %v1711_v35 = vadd.f32 %v1709_v32, %v3288_v3  ;;  %v1838_v41 = vadd.f32 %v1836_v1, %v3288_v3 }
 0xaac   : > { %v1715_v38 = vsel %vm895_vm3, %v1711_v35, -inf  ;;  %v1842_v42 = vsel %vm895_vm3, %v1838_v41, -inf }
 0xaad   : > { %1840 = vmax.xlane.f32.xlu1 %v1839_v37  ;;  %1716 = vmax.xlane.f32.xlu0 %v1715_v38 }
 0xab1   : > { %1843 = vmax.xlane.f32.xlu1 %v1842_v42 }
 0xb32   : > { %v1714_v44 = vpop.xlane.xlu1 %1713 }
 0xb33   : > { %v1718_v46 = vsub.f32 %v1710_v29, %v1714_v44 }
 0xb35   : > { %v1720_v47 = vmul.f32 1.442695, %v1718_v46 }
 0xb36   : > { %v1841_v60 = vpop.xlane.xlu1 %1840  ;;  %v1717_v48 = vpop.xlane.xlu0 %1716 }
 0xb37   : > { %2998 = vpow2.f32 %v1720_v47  ;;  %v1845_v49 = vsub.f32 %v1837_v33, %v1841_v60  ;;  %v1719_v50 = vsub.f32 %v1711_v35, %v1717_v48 }
 0xb39   : > { %v1847_v51 = vmul.f32 1.442695, %v1845_v49  ;;  %v1722_v52 = vmul.f32 1.442695, %v1719_v50  ;;  %v2930_v49 = vld [vmem:[%s3681_s11 + $0x30] ss:$8 sps:$4 sm:$0xff]  }
 0xb3a   : > { %v1844_v53 = vpop.xlane.xlu1 %1843  ;;  %v2933_v50 = vld [vmem:[%s3681_s11 + $0x20] ss:$8 sps:$4 sm:$0xff]  }
 0xb3b   : > { %3000 = vpow2.f32 %v1847_v51  ;;  %v1846_v54 = vsub.f32 %v1838_v41, %v1844_v53  ;;  %v2938_v51 = vld [vmem:[%s3681_s11 + $0x14] ss:$8 sps:$4 sm:$0xff]   ;;  %v2939_v53 = vld [vmem:[%s3681_s11] ss:$8 sps:$4 sm:$0xff]  }
 0xb3c   : > { %3002 = vpow2.f32 %v1722_v52  ;;  %v2936_v52 = vld [vmem:[%s3681_s11 + $0x10] ss:$8 sps:$4 sm:$0xff]  }
 0xb3d   : > { %v1849_v3 = vmul.f32 1.442695, %v1846_v54  ;;  %v2941_v54 = vld [vmem:[%s3681_s11 + $0x4] ss:$8 sps:$4 sm:$0xff]  }
 0xb3f   : > { %3004 = vpow2.f32 %v1849_v3 }
 0xb44   : > { %v2999_v55 = vpop.eup %2998 }
 0xb45   : > { %v1724_v56 = vsel %vm895_vm3, %v2999_v55, 0.0 }
 0xb46   : > { %1725 = vadd.xlane.f32.xlu1 %v1724_v56 }
 0xb48   : > { %v3001_v45 = vpop.eup %3000 }
 0xb49   : > { %v3003_v57 = vpop.eup %3002  ;;  %v1851_v58 = vsel %vm895_vm3, %v3001_v45, 0.0 }
 0xb4a   : > { %1852 = vadd.xlane.f32.xlu1 %v1851_v58  ;;  %v1727_v59 = vsel %vm895_vm3, %v3003_v57, 0.0 }
 0xb4b   : > { %1728 = vadd.xlane.f32.xlu0 %v1727_v59 }
 0xb4c   : > { %v3005_v61 = vpop.eup %3004 }
 0xb4d   : > { %v1854_v62 = vsel %vm895_vm3, %v3005_v61, 0.0 }
 0xb4f   : > { %1855 = vadd.xlane.f32.xlu0 %v1854_v62 }
 0xb5b   : > { %1863 = vrot.lane.b32.xlu1 %v3478_v36, %s3704_s20  ;;  %s626_s20 = scalar_lea.vmem %s3689_s19, %s3164_s21 }
 0xbcf   : > { %v1726_v63 = vpop.xlane.xlu1 %1725 }
 0xbd0   : > { %3006 = vrcp.f32 %v1726_v63  ;;  %v2620_v63 = vld [vmem:[%s3680_s10] ss:$0 sm:$0xff] }
 0xbd3   : > { %v1853_v4 = vpop.xlane.xlu1 %1852 }
 0xbd4   : > { %v1729_v2 = vpop.xlane.xlu0 %1728 }
 0xbd5   : > { %3008 = vrcp.f32 %v1729_v2 }
 0xbd7   : > { %v1864_v14 = vpop.permute.xlu1 %1863 }
 0xbd8   : > { %v1856_v5 = vpop.xlane.xlu0 %1855 }
 0xbd9   : > { %3010 = vrcp.f32 %v1856_v5 }
 0xbda   : > { %3012 = vrcp.f32 %v1853_v4 }
 0xbdd   : > { %v3007_v6 = vpop.eup %3006 }
 0xbde   : > { %v1732_v9 = vmul.f32 %v3007_v6, %v2999_v55 }
 0xbe2   : > { %v3009_v7 = vpop.eup %3008 }
 0xbe3   : > { %v1733_v10 = vmul.f32 %v3009_v7, %v3003_v57  ;;  %v2942_v7 = vld [vmem:[%s3682_s12 + $0x38] sm:$0xff]  }
 0xbe5   : > { %v1734_v12 = vpack.c.bf16 %v1733_v10, %v1732_v9  ;;  %v2943_v9 = vld [vmem:[%s3682_s12 + $0x30] sm:$0xff]   ;;  %v2944_v10 = vld [vmem:[%s3682_s12 + $0x28] sm:$0xff]  }
 0xbe6   : > { %v3011_v13 = vpop.eup %3010 }
 0xbe7   : > { %2803 = vmatmul.mubr.msk.bf16.vlgmr.msra.gmra.mxu1 %vm895_vm3, %v1734_v12  ;;  %v3013_v15 = vpop.eup %3012  ;;  %v1860_v16 = vmul.f32 %v3011_v13, %v3005_v61  ;;  %v2945_v12 = vld [vmem:[%s3682_s12 + $0x20] sm:$0xff]   ;;  %v2946_v13 = vld [vmem:[%s3682_s12 + $0x18] sm:$0xff]  }
 0xbe8   : > { %2813 = vmatpush3.bf16.msra.mxu1 %v1864_v14  ;;  %2814 = vmatprep.mubr.msk.bf16.mxu1 %vm3052_vm1, %v3050_v8  ;;  %v1859_v36 = vmul.f32 %v3013_v15, %v3001_v45  ;;  %v2947_v14 = vld [vmem:[%s3682_s12 + $0x10] sm:$0xff]   ;;  %v2948_v15 = vld [vmem:[%s3682_s12 + $0x8] sm:$0xff]  }
 0xbe9   : > { %2826 = vmatprep.subr.bf16.mxu1 %v3050_v8 }
 0xbea   : > { %v1861_v17 = vpack.c.bf16 %v1860_v16, %v1859_v36  ;;  %v2949_v16 = vld [vmem:[%s3682_s12] sm:$0xff]  }
 0xbef   : > { %2815 = vmatmul.mubr.msk.bf16.vlgmr.msra.gmra.mxu1 %vm895_vm3, %v1861_v17 }
 0xbf0   : > { %2830 = vmatprep.mubr.msk.bf16.mxu1 %vm3052_vm1, %v3050_v8  ;;  %2827 = vmatpush3.bf16.msra.mxu1 %v2926_v39 }
 0xbf1   : > { %2828 = vmatprep.subr.bf16.mxu1 %v3050_v8 }
 0xbf4   : > { %2829 = vmatpush3.bf16.msra.mxu1 %v2927_v18 }
 0xbf5   : > { %2834 = vmatprep.subr.bf16.mxu1 %v3050_v8 }
 0xca7   : > { %v1772_v19 = vpop.f32.mrf.mxu1 }
 0xca9   : > { %v2804_v20 = vpop.f32.mrf.mxu1 }
 0xcab   : > { %v1775_v21 = vpop.f32.mrf.mxu1 }
 0xcac   : > { %v1783_v22 = vpack.c.bf16 %v1775_v21, %v1772_v19 }
 0xcad   : > { %v2805_v24 = vpop.f32.mrf.mxu1 }
 0xcae   : > { %2831 = vmatmul.mubr.msk.bf16.vlgmr.msra.gmra.mxu1 %vm843_vm2, %v1783_v22 }
 0xcaf   : > { %v1903_v26 = vpop.f32.mrf.mxu1  ;;  %2850 = vmatprep.mubr.msk.bf16.mxu1 %vm3052_vm1, %v3050_v8  ;;  %2835 = vmatpush3.bf16.msra.mxu1 %v2942_v7 }
 0xcb0   : > { %2836 = vmatprep.subr.bf16.mxu1 %v3050_v8 }
 0xcb1   : > { %v2816_v27 = vpop.f32.mrf.mxu1 }
 0xcb3   : > { %v1906_v29 = vpop.f32.mrf.mxu1  ;;  %2837 = vmatpush3.bf16.msra.mxu1 %v2943_v9  ;;  %v3643_v9 = vld [vmem:[%s620_s28] sm:$0xff] }
 0xcb4   : > { %v1914_v31 = vpack.c.bf16 %v1906_v29, %v1903_v26  ;;  %2838 = vmatprep.subr.bf16.mxu1 %v3050_v8  ;;  %vm2426_vm4 = vcmp.ne.s32.totalorder %v3643_v9, 4294967196 }
 0xcb5   : > { %v2817_v0 = vpop.f32.mrf.mxu1 }
 0xcb6   : > { %2823 = vmatmul.mubr.msk.bf16.vlgmr.msra.gmra.mxu0 %vm843_vm2, %v1914_v31 }
 0xcb7   : > { %2138 = vmatprep.mubr.bf16.mxu0 %v3051_v11  ;;  %2839 = vmatpush3.bf16.msra.mxu1 %v2944_v10  ;;  %v2438_v10 = vsel %vm2426_vm4, 1, %v3051_v11 }
 0xcb8   : > { %2840 = vmatprep.subr.bf16.mxu1 %v3050_v8 }
 0xcbb   : > { %2841 = vmatpush3.bf16.msra.mxu1 %v2945_v12  ;;  %v3650_v12 = vld [vmem:[%s620_s28 + $0x8] sm:$0xff] }
 0xcbc   : > { %2842 = vmatprep.subr.bf16.mxu1 %v3050_v8  ;;  %vm2427_vm5 = vcmp.ne.s32.totalorder %v3650_v12, 4294967196 }
 0xcbf   : > { %2843 = vmatpush3.bf16.msra.mxu1 %v2946_v13  ;;  %v2439_v13 = vsel %vm2427_vm5, 1, %v3051_v11 }
 0xcc0   : > { %2844 = vmatprep.subr.bf16.mxu1 %v3050_v8 }
 0xcc3   : > { %2845 = vmatpush3.bf16.msra.mxu1 %v2947_v14 }
 0xcc4   : > { %2846 = vmatprep.subr.bf16.mxu1 %v3050_v8 }
 0xcc7   : > { %2847 = vmatpush3.bf16.msra.mxu1 %v2948_v15 }
 0xcc8   : > { %2848 = vmatprep.subr.bf16.mxu1 %v3050_v8 }
 0xccb   : > { %2849 = vmatpush3.bf16.msra.mxu1 %v2949_v16 }
 0xd6e   : > { %v2020_v32 = vpop.f32.mrf.mxu1 }
 0xd70   : > { %v2832_v1 = vpop.f32.mrf.mxu1 }
 0xd72   : > { %v2023_v23 = vpop.f32.mrf.mxu1 }
 0xd74   : > { %v2833_v33 = vpop.f32.mrf.mxu1 }
 0xd76   : > { %v1964_v28 = vpop.f32.mrf.mxu0 }
 0xd77   : > { %v2021_v34 = vadd.f32 %v2020_v32, %v1964_v28 }
 0xd78   : > { %v2824_v35 = vpop.f32.mrf.mxu0 }
 0xd79   : > { %v3534_v37 = vadd.f32 %v2021_v34, %v3408_v25  ;;  %v2932_v25 = vld [vmem:[%s3681_s11 + $0x34] ss:$8 sps:$4 sm:$0xff]  }
 0xd7a   : > { %v1967_v38 = vpop.f32.mrf.mxu0  ;;  %2114 = vmatprep.subr.bf16.mxu0 %v2932_v25  ;;  %v2956_v25 = vld [vmem:[%s3687_s17 + $0x10] ss:$8 sps:$4 sm:$0xff]  }
 0xd7b   : > { %v2024_v41 = vadd.f32 %v2023_v23, %v1967_v38  ;;  %v2029_v42 = vmul.f32 %v3534_v37, %v3534_v37  ;;  %2115 = vmatpush1.bf16.msra.mxu0 %v2930_v49  ;;  %v2959_v49 = vld [vmem:[%s3687_s17] ss:$8 sps:$4 sm:$0xff]  }
 0xd7c   : > { %v2825_v44 = vpop.f32.mrf.mxu0 }
 0xd7d   : > { %v3539_v46 = vadd.f32 %v2024_v41, %v3413_v30  ;;  %v2031_v47 = vsel %vm639_vm0, %v2029_v42, 0.0  ;;  %v2935_v30 = vld [vmem:[%s3681_s11 + $0x24] ss:$8 sps:$4 sm:$0xff]  }
 0xd7e   : > { %2032 = vadd.xlane.f32.xlu0 %v2031_v47  ;;  %2116 = vmatprep.subr.bf16.mxu0 %v2935_v30  ;;  %v2952_v47 = vld [vmem:[%s3687_s17 + $0x34] ss:$8 sps:$4 sm:$0xff]   ;;  %v2961_v30 = vld [vmem:[%s3687_s17 + $0x4] ss:$8 sps:$4 sm:$0xff]  }
 0xd7f   : > { %v2030_v60 = vmul.f32 %v3539_v46, %v3539_v46  ;;  %2117 = vmatpush1.bf16.msra.mxu0 %v2933_v50 }
 0xd80   : > { %2118 = vmatprep.subr.bf16.mxu0 %v2938_v51 }
 0xd81   : > { %v2034_v48 = vsel %vm639_vm0, %v2030_v60, 0.0  ;;  %v2953_v60 = vld [vmem:[%s3687_s17 + $0x20] ss:$8 sps:$4 sm:$0xff]  }
 0xd82   : > { %2035 = vadd.xlane.f32.xlu0 %v2034_v48  ;;  %v2958_v48 = vld [vmem:[%s3687_s17 + $0x14] ss:$8 sps:$4 sm:$0xff]  }
 0xd83   : > { %2119 = vmatpush1.bf16.msra.mxu0 %v2936_v52 }
 0xd84   : > { %2120 = vmatprep.subr.bf16.mxu0 %v2941_v54 }
 0xd87   : > { %2121 = vmatpush1.bf16.msra.mxu0 %v2939_v53 }
 0xd88   : > { %2358 = vmatprep.subr.bf16.mxu0 %v2952_v47 }
 0xe07   : > { %v2033_v3 = vpop.xlane.xlu0 %2032 }
 0xe08   : > { %v2037_v55 = vmul.f32 0.015625, %v2033_v3 }
 0xe0a   : > { %v2039_v56 = vadd.f32 1e-06, %v2037_v55 }
 0xe0b   : > { %v2036_v45 = vpop.xlane.xlu0 %2035 }
 0xe0c   : > { %3014 = vrsqrt.f32 %v2039_v56  ;;  %v2038_v57 = vmul.f32 0.015625, %v2036_v45 }
 0xe0e   : > { %v2040_v58 = vadd.f32 1e-06, %v2038_v57  ;;  %v2640_v57 = vld [vmem:[%s3686_s16] ss:$0 sm:$0xff] }
 0xe10   : > { %3016 = vrsqrt.f32 %v2040_v58 }
 0xe19   : > { %v3015_v59 = vpop.eup %3014 }
 0xe1a   : > { %v2043_v61 = vmul.f32 %v3015_v59, %v3534_v37 }
 0xe1c   : > { %v2052_v4 = vmul.f32 %v2620_v63, %v2043_v61 }
 0xe1d   : > { %v3017_v62 = vpop.eup %3016 }
 0xe1e   : > { %v2044_v2 = vmul.f32 %v3017_v62, %v3539_v46 }
 0xe20   : > { %v2053_v5 = vmul.f32 %v2620_v63, %v2044_v2 }
 0xe22   : > { %v2054_v6 = vpack.c.bf16 %v2053_v5, %v2052_v4 }
 0xe24   : > { %2629 = vmatmul.mubr.msk.bf16.vlgmr.msra.gmra.mxu0 %vm639_vm0, %v2054_v6 }
 0xe25   : > { %2382 = vmatprep.mubr.bf16.mxu0 %v3051_v11 }
 0xee4   : > { %v2140_v36 = vpop.f32.mrf.mxu0 }
 0xee5   : > { %v2630_v17 = vmul.f32 -1.442695, %v2140_v36 }
 0xee6   : > { %v2142_v39 = vpop.f32.mrf.mxu0 }
 0xee7   : > { %3018 = vpow2.f32 %v2630_v17 }
 0xee8   : > { %v2144_v18 = vpop.f32.mrf.mxu0 }
 0xee9   : > { %v2631_v40 = vmul.f32 -1.442695, %v2144_v18 }
 0xeea   : > { %v2146_v29 = vpop.f32.mrf.mxu0 }
 0xeeb   : > { %3020 = vpow2.f32 %v2631_v40 }
 0xef4   : > { %v3019_v43 = vpop.eup %3018 }
 0xef5   : > { %v2155_v19 = vadd.f32 1.0, %v3019_v43  ;;  %v2423_v43 = vlaneseq }
 0xef7   : > { %3022 = vrcp.f32 %v2155_v19 }
 0xef8   : > { %v3021_v20 = vpop.eup %3020 }
 0xef9   : > { %v2156_v21 = vadd.f32 1.0, %v3021_v20 }
 0xefb   : > { %3024 = vrcp.f32 %v2156_v21 }
 0xf04   : > { %v3023_v22 = vpop.eup %3022 }
 0xf05   : > { %v2161_v24 = vmul.f32 %v3023_v22, %v2140_v36  ;;  %v2424_v22 = vand.u32 127, %v2423_v43 }
 0xf07   : > { %v2163_v31 = vmul.f32 %v2161_v24, %v2142_v39  ;;  %v2425_v11 = vadd.s32 128, %v2424_v22 }
 0xf08   : > { %v3025_v26 = vpop.eup %3024 }
 0xf09   : > { %v2162_v27 = vmul.f32 %v3025_v26, %v2144_v18 }
 0xf0b   : > { %v2164_v0 = vmul.f32 %v2162_v27, %v2146_v29 }
 0xf0d   : > { %v2165_v32 = vpack.c.bf16 %v2164_v0, %v2163_v31 }
 0xf0f   : > { %2851 = vmatmul.mubr.bf16.vlgmr.msra.gmra.mxu1 %v2165_v32 }
 0xfcf   : > { %v2264_v1 = vpop.f32.mrf.mxu1 }
 0xfd0   : > { %v2271_v23 = vadd.f32 %v2264_v1, %v3534_v37  ;;  %v2950_v37 = vld [vmem:[%s3687_s17 + $0x30] ss:$8 sps:$4 sm:$0xff]  }
 0xfd1   : > { %v2852_v33 = vpop.f32.mrf.mxu1  ;;  %2359 = vmatpush1.bf16.msra.mxu0 %v2950_v37 }
 0xfd2   : > { %v2273_v28 = vmul.f32 %v2271_v23, %v2271_v23 }
 0xfd3   : > { %v2267_v34 = vpop.f32.mrf.mxu1 }
 0xfd4   : > { %v2272_v35 = vadd.f32 %v2267_v34, %v3539_v46  ;;  %v2275_v38 = vsel %vm639_vm0, %v2273_v28, 0.0  ;;  %v2955_v46 = vld [vmem:[%s3687_s17 + $0x24] ss:$8 sps:$4 sm:$0xff]  }
 0xfd5   : > { %2276 = vadd.xlane.f32.xlu0 %v2275_v38  ;;  %v2853_v41 = vpop.f32.mrf.mxu1  ;;  %2360 = vmatprep.subr.bf16.mxu0 %v2955_v46  ;;  %v2650_v46 = vsel %vm2426_vm4, 1.0, %v3050_v8 }
 0xfd6   : > { %v2274_v42 = vmul.f32 %v2272_v35, %v2272_v35  ;;  %2361 = vmatpush1.bf16.msra.mxu0 %v2953_v60 }
 0xfd7   : > { %2362 = vmatprep.subr.bf16.mxu0 %v2958_v48 }
 0xfd8   : > { %v2278_v44 = vsel %vm639_vm0, %v2274_v42, 0.0 }
 0xfd9   : > { %2279 = vadd.xlane.f32.xlu0 %v2278_v44 }
 0xfda   : > { %2363 = vmatpush1.bf16.msra.mxu0 %v2956_v25 }
 0xfdb   : > { %2364 = vmatprep.subr.bf16.mxu0 %v2961_v30 }
 0xfde   : > { %2365 = vmatpush1.bf16.msra.mxu0 %v2959_v49 }
0x105e   : > { %v2277_v50 = vpop.xlane.xlu0 %2276 }
0x105f   : > { %v2281_v51 = vmul.f32 0.015625, %v2277_v50  ;;  %v2651_v50 = vsel %vm2427_vm5, 1.0, %v3050_v8 }
0x1061   : > { %v2283_v52 = vadd.f32 1e-06, %v2281_v51 }
0x1062   : > { %v2280_v53 = vpop.xlane.xlu0 %2279 }
0x1063   : > { %3026 = vrsqrt.f32 %v2283_v52  ;;  %v2282_v54 = vmul.f32 0.015625, %v2280_v53 }
0x1065   : > { %v2284_v3 = vadd.f32 1e-06, %v2282_v54 }
0x1067   : > { %3028 = vrsqrt.f32 %v2284_v3 }
0x1070   : > { %v3027_v55 = vpop.eup %3026 }
0x1071   : > { %v2287_v56 = vmul.f32 %v3027_v55, %v2271_v23 }
0x1073   : > { %v2296_v59 = vmul.f32 %v2640_v57, %v2287_v56 }
0x1074   : > { %v3029_v45 = vpop.eup %3028 }
0x1075   : > { %v2288_v58 = vmul.f32 %v3029_v45, %v2272_v35 }
0x1077   : > { %v2297_v61 = vmul.f32 %v2640_v57, %v2288_v58 }
0x1079   : > { %v2298_v62 = vpack.c.bf16 %v2297_v61, %v2296_v59 }
0x107b   : > { %2649 = vmatmul.mubr.msk.bf16.vlgmr.msra.gmra.mxu0 %vm639_vm0, %v2298_v62  ;;  %vm2468_vm0 = vcmask 7168  }
0x113b   : > { %v2384_v63 = vpop.f32.mrf.mxu0 }
0x113d   : > { %v2386_v2 = vpop.f32.mrf.mxu0 }
0x113e   : > { %v2395_v4 = vmax.f32 %v2384_v63, %v2386_v2 }
0x113f   : > { %v2388_v5 = vpop.f32.mrf.mxu0 }
0x1140   : > { %2396 = vmax.xlane.f32.xlu0 %v2395_v4 }
0x1141   : > { %v2390_v6 = vpop.f32.mrf.mxu0 }
0x1142   : > { %v2398_v7 = vmax.f32 %v2388_v5, %v2390_v6 }
0x1144   : > { %2399 = vmax.xlane.f32.xlu1 %v2398_v7 }
0x1155   : > { %2441 = vperm.xlu1 %2869, %v2438_v10  }
0x1156   : > { %2429 = vperm.xlu0 %2868, %v3643_v9  }
0x115a   : > { %2432 = vperm.xlu0 %2868, %v3650_v12  }
0x115e   : > { %2444 = vperm.xlu0 %2868, %v2439_v13  }
0x11c9   : > { %v2397_v14 = vpop.xlane.xlu0 %2396 }
0x11ca   : > { %v2401_v15 = vsub.f32 %v2384_v63, %v2397_v14  ;;  %v2402_v16 = vsub.f32 %v2386_v2, %v2397_v14 }
0x11cc   : > { %v2405_v36 = vmul.f32 1.442695, %v2401_v15  ;;  %v2407_v17 = vmul.f32 1.442695, %v2402_v16 }
0x11cd   : > { %v2400_v39 = vpop.xlane.xlu1 %2399 }
0x11ce   : > { %3030 = vpow2.f32 %v2405_v36  ;;  %v2403_v18 = vsub.f32 %v2388_v5, %v2400_v39  ;;  %v2404_v40 = vsub.f32 %v2390_v6, %v2400_v39 }
0x11cf   : > { %3032 = vpow2.f32 %v2407_v17 }
0x11d0   : > { %v2409_v19 = vmul.f32 1.442695, %v2403_v18  ;;  %v2411_v20 = vmul.f32 1.442695, %v2404_v40 }
0x11d1   : > { %v2430_v21 = vpop.permute.xlu0 %2429  ;;  %v2442_v26 = vpop.permute.xlu1 %2441 }
0x11d2   : > { %3034 = vpow2.f32 %v2409_v19  ;;  %vm2434_vm9 = vcmp.eq.s32.totalorder %v2424_v22, %v2430_v21  ;;  %vm2446_vm10 = vcmp.eq.s32.totalorder %v2442_v26, 1  ;;  %vm2435_vm12 = vcmp.eq.s32.totalorder %v2425_v11, %v2430_v21 }
0x11d3   : > { %3036 = vpow2.f32 %v2411_v20  ;;  %vm2448_vm14 = vmand %vm2434_vm9, %vm2446_vm10 }
0x11d4   : > { %vm2449_vm15 = vmand %vm2435_vm12, %vm2446_vm10  ;;  %v2452_v35 = vsel %vm2448_vm14, %v2401_v15, 0.0 }
0x11d5   : > { %v2433_v24 = vpop.permute.xlu0 %2432  ;;  %v2453_v38 = vsel %vm2449_vm15, %v2402_v16, 0.0 }
0x11d6   : > { %vm2436_vm6 = vcmp.eq.s32.totalorder %v2424_v22, %v2433_v24  ;;  %vm2437_vm7 = vcmp.eq.s32.totalorder %v2425_v11, %v2433_v24  ;;  %v2456_v41 = vadd.f32 %v2453_v38, %v2452_v35 }
0x11d9   : > { %v2445_v27 = vpop.permute.xlu0 %2444 }
0x11da   : > { %vm2447_vm8 = vcmp.eq.s32.totalorder %v2445_v27, 1 }
0x11db   : > { %v3031_v29 = vpop.eup %3030  ;;  %vm2450_vm11 = vmand %vm2436_vm6, %vm2447_vm8 }
0x11dc   : > { %v3033_v31 = vpop.eup %3032  ;;  %vm2451_vm13 = vmand %vm2437_vm7, %vm2447_vm8  ;;  %v2454_v32 = vsel %vm2450_vm11, %v2403_v18, 0.0 }
0x11dd   : > { %v2413_v0 = vadd.f32 %v3033_v31, %v3031_v29  ;;  %v2455_v1 = vsel %vm2451_vm13, %v2404_v40, 0.0 }
0x11de   : > { %v2459_v28 = vadd.f32 %v2455_v1, %v2454_v32 }
0x11df   : > { %v3035_v23 = vpop.eup %3034  ;;  %2414 = vadd.xlane.f32.xlu1 %v2413_v0 }
0x11e0   : > { %v3037_v33 = vpop.eup %3036 }
0x11e1   : > { %v2416_v34 = vadd.f32 %v3037_v33, %v3035_v23 }
0x11e3   : > { %2460 = vadd.xlane.f32.xlu1 %v2459_v28  ;;  %2417 = vadd.xlane.f32.xlu0 %v2416_v34 }
0x11e7   : > { %2457 = vadd.xlane.f32.xlu0 %v2456_v41 }
0x1268   : > { %v2415_v42 = vpop.xlane.xlu1 %2414 }
0x1269   : > { %3038 = vlog2.f32 %v2415_v42 }
0x126c   : > { %v2418_v44 = vpop.xlane.xlu0 %2417  ;;  %v2461_v51 = vpop.xlane.xlu1 %2460 }
0x126d   : > { %3040 = vlog2.f32 %v2418_v44 }
0x1270   : > { %v2458_v60 = vpop.xlane.xlu0 %2457 }
0x1276   : > { %v3039_v47 = vpop.eup %3038 }
0x1277   : > { %v2420_v37 = vmul.f32 0.6931472, %v3039_v47 }
0x1279   : > { %v2462_v48 = vsub.f32 %v2420_v37, %v2458_v60 }
0x127a   : > { %v3041_v25 = vpop.eup %3040 }
0x127b   : > { %v2422_v49 = vmul.f32 0.6931472, %v3041_v25  ;;  %v2466_v30 = vmul.f32 %v2650_v46, %v2462_v48 }
0x127d   : > { %v2463_v52 = vsub.f32 %v2422_v49, %v2461_v51  ;;  %2469 = vst.msk [vmem:[%s626_s20] sm:$0xff] %vm2468_vm0, %v2466_v30 }
0x127f   : > { %v2467_v53 = vmul.f32 %v2651_v50, %v2463_v52 }
0x1281   : > { %2470 = vst.msk [vmem:[%s626_s20 + $0x8] sm:$0xff] %vm2468_vm0, %v2467_v53 }
0x1282 PF: > { %s29_s0 = sadd.s32 1, %s3048_s0  }
0x1283   : > { %p26_p4 = scmp.ge.s32.totalorder %s29_s0, 4  }
0x1285   :  { %28 = sbr.rel (!%p26_p4) target bundleno = 5 (0x5), region = 129 }

</bundles_post_ra>
